<compile_context>
chip_gen: v7x
topology: tpu7x:2x2x1
jax: 0.10.0
libtpu: 0.0.40
codegen_flags: <defaults>
</compile_context>

<pallas_src>
import functools

import jax
import jax.numpy as jnp
import numpy as np
from jax.experimental import pallas as pl
from jax.experimental.pallas import tpu as pltpu


# ----------------------------------------------------------------------------
# Fused Pallas kernel: all NVGF layers + per-node readout MLP in one pass.
# ----------------------------------------------------------------------------
def _fused_forward_kernel(*refs, nvgf_K, nvgf_G, n_readout, tbN, has_shifts):
    # refs layout (positional, matching the wrapper's input list):
    #   x_ref                      (F0, tbN)   lane-dense slab, col = bt*N + n
    #   [sbp_ref]                  (tbN, (Kmax-1)*tbN)  stacked kron(I_tb, S^k)
    #   per NVGF layer: h_ref      (K, G, Fout, tbN), b_ref (Fout, tbN)
    #   per readout   : w_ref      (Rin, Rout, tbN),  b_ref (Rout, tbN)
    #   o_ref                      (R, tbN)
    idx = 0
    x_ref = refs[idx]
    idx += 1
    sbp_ref = None
    if has_shifts:
        sbp_ref = refs[idx]
        idx += 1
    o_ref = refs[-1]
    params = refs[idx:-1]

    # f32 accumulation regardless of storage dtype.
    y = x_ref[...].astype(jnp.float32)            # (F0, tbN)

    p = 0
    # --- node-variant graph filter layers (each followed by ReLU) -----------
    for K, G in zip(nvgf_K, nvgf_G):
        h_ref = params[p]                          # (K, G, Fout, tbN)
        b_ref = params[p + 1]                      # (Fout, tbN)
        p += 2

        acc = b_ref[...].astype(jnp.float32)       # start from the bias

        # k = 0 taps: pure VPU FMAs on (Fout, tbN) vregs.
        for g in range(G):
            acc = acc + h_ref[0, g, :, :] * y[g:g + 1, :]

        if K > 1:
            # All shifted slabs x @ S^1 .. x @ S^(K-1) in ONE wide MXU matmul
            # (no serial S^k dependency chain).
            zk_all = jnp.dot(y, sbp_ref[:, : (K - 1) * tbN],
                             preferred_element_type=jnp.float32)
            for k in range(1, K):
                zk = zk_all[:, (k - 1) * tbN: k * tbN]
                for g in range(G):
                    acc = acc + h_ref[k, g, :, :] * zk[g:g + 1, :]

        y = jnp.maximum(acc, 0.0)

    # --- per-node readout MLP: unrolled VPU FMAs (no tiny MXU matmuls) ------
    for r in range(n_readout):
        w_ref = params[p]                          # (Rin, Rout, tbN)
        b_ref = params[p + 1]                      # (Rout, tbN)
        p += 2
        Rin = w_ref.shape[0]
        acc = b_ref[...].astype(jnp.float32)
        for f in range(Rin):
            acc = acc + w_ref[f] * y[f:f + 1, :]
        y = acc if r == n_readout - 1 else jnp.maximum(acc, 0.0)

    o_ref[...] = y.astype(o_ref.dtype)


# ----------------------------------------------------------------------------
# Generation-aware sizing helpers
# ----------------------------------------------------------------------------
def _num_tensorcores():
    """TensorCores per JAX device visible to one pallas_call grid."""
    try:
        kind = jax.devices()[0].device_kind.lower()
    except Exception:
        return 1
    if "v7" in kind:
        return 2                      # 2 TCs per chip
    if ("v4" in kind) or ("v5p" in kind) or ("v5 p" in kind):
        return 2                      # megacore
    return 1                          # v5e / v6e: single TensorCore


def _vmem_limit_bytes():
    try:
        cap = int(pltpu.get_tpu_info().vmem_capacity_bytes)
        # Stay well inside the physical budget (matters on v7x: 64 MiB/TC).
        return max(32 * 1024 * 1024, min((cap * 3) // 4, 100 * 1024 * 1024))
    except Exception:
        return 32 * 1024 * 1024


def _choose_tb(BT, N, n_cores, max_lanes=2048):
    """Pick how many (batch*time) samples to fold onto the lane axis per step.

    Constraints: tb divides BT; tb*N is a multiple of 128 unless the grid has
    a single step (full-array block is always legal); tb*N capped so the tap
    accumulator + K shifted slabs stay register-resident.  Prefer the largest
    tile that still gives every TensorCore at least one grid step.
    """
    legal = []
    for tb in range(1, BT + 1):
        if BT % tb:
            continue
        steps = BT // tb
        if steps > 1 and (tb * N) % 128 != 0:
            continue
        legal.append(tb)
    if not legal:
        return BT
    pref = [tb for tb in legal if tb * N <= max_lanes] or legal
    for tb in sorted(pref, reverse=True):
        if BT // tb >= n_cores:
            return tb
    return max(pref)


# ----------------------------------------------------------------------------
# One-time preparation (layout plumbing hoisted out of the per-call path) +
# jitted forward built around a single pallas_call.
# ----------------------------------------------------------------------------
def make_local_node_variant_t(S, nvgf_params, readout_params, *, batch, time,
                              dtype=None):
    N = S.shape[-1]
    F0 = nvgf_params[0][0].shape[2] if nvgf_params else readout_params[0][0].shape[1]
    BT = batch * time
    if dtype is None:
        dtype = S.dtype

    n_cores = _num_tensorcores()
    tb = _choose_tb(BT, N, n_cores)
    tbN = tb * N
    n_steps = BT // tb

    Kmax = max((h.shape[1] for h, _ in nvgf_params), default=1)
    has_shifts = Kmax > 1

    weights = []
    weight_specs = []

    # --- stacked shift powers: [kron(I_tb, S^1) | ... | kron(I_tb, S^(Kmax-1))]
    if has_shifts:
        Sf = S.astype(jnp.float32)
        I_tb = jnp.eye(tb, dtype=jnp.float32)
        pows, Sk = [], Sf
        for k in range(1, Kmax):
            if k > 1:
                Sk = Sk @ Sf
            pows.append(jnp.kron(I_tb, Sk))
        Sp = jnp.concatenate(pows, axis=1).astype(dtype)     # (tbN, (Kmax-1)*tbN)
        ncols = (Kmax - 1) * tbN
        weights.append(Sp)
        weight_specs.append(pl.BlockSpec((tbN, ncols), lambda i: (0, 0)))

    # --- node-variant taps + biases, lane-dense over the folded (bt, n) axis
    nvgf_K, nvgf_G = [], []
    for h, b in nvgf_params:
        Fout, K, G, Nh = h.shape
        assert Nh == N
        nvgf_K.append(K)
        nvgf_G.append(G)
        # (Fout, K, G, N) -> (K, G, Fout, N) -> tile node axis over tb samples
        # (replication is bounded by the tbN cap; one resident block, constant
        #  index map, shared across all grid steps).
        h_wide = jnp.tile(jnp.transpose(h, (1, 2, 0, 3)), (1, 1, 1, tb)).astype(dtype)
        b_wide = jnp.broadcast_to(b.reshape(Fout, 1), (Fout, tbN)).astype(dtype)
        weights += [h_wide, b_wide]
        weight_specs += [
            pl.BlockSpec((K, G, Fout, tbN), lambda i: (0, 0, 0, 0)),
            pl.BlockSpec((Fout, tbN), lambda i: (0, 0)),
        ]

    # --- per-node readout linears, pre-broadcast lane-dense for VPU FMAs
    for w, b in readout_params:
        Rout, Rin = w.shape
        w_wide = jnp.broadcast_to(
            jnp.transpose(w).reshape(Rin, Rout, 1), (Rin, Rout, tbN)).astype(dtype)
        b_wide = jnp.broadcast_to(b.reshape(Rout, 1), (Rout, tbN)).astype(dtype)
        weights += [w_wide, b_wide]
        weight_specs += [
            pl.BlockSpec((Rin, Rout, tbN), lambda i: (0, 0, 0)),
            pl.BlockSpec((Rout, tbN), lambda i: (0, 0)),
        ]

    R = (readout_params[-1][0].shape[0] if readout_params
         else nvgf_params[-1][0].shape[0])

    kernel = functools.partial(
        _fused_forward_kernel,
        nvgf_K=tuple(nvgf_K),
        nvgf_G=tuple(nvgf_G),
        n_readout=len(readout_params),
        tbN=tbN,
        has_shifts=has_shifts,
    )

    call = pl.pallas_call(
        kernel,
        out_shape=jax.ShapeDtypeStruct((R, BT * N), dtype),
        grid_spec=pltpu.PrefetchScalarGridSpec(
            num_scalar_prefetch=0,
            grid=(n_steps,),
            in_specs=[pl.BlockSpec((F0, tbN), lambda i: (0, i))] + weight_specs,
            out_specs=pl.BlockSpec((R, tbN), lambda i: (0, i)),
        ),
        compiler_params=pltpu.CompilerParams(
            dimension_semantics=("parallel",),
            vmem_limit_bytes=_vmem_limit_bytes(),
        ),
    )

    weights = tuple(jnp.asarray(w) for w in weights)

    @jax.jit
    def forward(x):
        Bx, Tx, F0x, Nx = x.shape
        # Lane-dense activation slab (F0, BT*N) with column index = bt*N + n.
        x2d = jnp.transpose(x.reshape(Bx * Tx, F0x, Nx),
                            (1, 0, 2)).reshape(F0x, Bx * Tx * Nx).astype(dtype)
        out2d = call(x2d, *weights)
        return jnp.transpose(out2d.reshape(R, Bx * Tx, Nx),
                             (1, 0, 2)).reshape(Bx, Tx, R, Nx)

    return forward


def local_node_variant_t_forward(x, S, nvgf_params, readout_params):
    B, T, _, _ = x.shape
    fwd = make_local_node_variant_t(S, nvgf_params, readout_params,
                                    batch=B, time=T, dtype=x.dtype)
    return fwd(x)


# ----------------------------------------------------------------------------
# Pure-JAX reference for a correctness check
# ----------------------------------------------------------------------------
def reference_forward(x, S, nvgf_params, readout_params):
    B, T, F0, N = x.shape
    y = x.reshape(B * T, F0, N)
    for h, b in nvgf_params:
        K = h.shape[1]
        zk = y
        acc = jnp.einsum("bgn,fgn->bfn", zk, h[:, 0])
        for k in range(1, K):
            zk = jnp.einsum("bgn,nm->bgm", zk, S)
            acc = acc + jnp.einsum("bgn,fgn->bfn", zk, h[:, k])
        y = jnp.maximum(acc + b[None, :, :], 0.0)
    for i, (w, b) in enumerate(readout_params):
        y = jnp.einsum("rf,bfn->brn", w, y) + b[None, :, :]
        if i < len(readout_params) - 1:
            y = jnp.maximum(y, 0.0)
    R = readout_params[-1][0].shape[0]
    return y.reshape(B, T, R, N)


# ----------------------------------------------------------------------------
# Main
# ----------------------------------------------------------------------------
if __name__ == "__main__":
    # Architecture hyper-parameters (small, consistent with the module)
    B, T, N = 2, 8, 16            # batch, timeSamples, numberNodes
    dimNodeSignals = [3, 8, 4]    # F
    nShiftTaps = [3, 2]           # K
    nNodeTaps = [N, N]            # M  (== N -> independent tap per node)
    dimReadout = [6, 2]
    dtype = jnp.float32

    key = jax.random.PRNGKey(0)
    keys = jax.random.split(key, 16)

    # Deterministic GSO: symmetric, zero-diagonal, spectral-norm normalized
    A = jax.random.normal(keys[0], (N, N), dtype=jnp.float32)
    A = 0.5 * (A + A.T)
    A = A * (1.0 - jnp.eye(N, dtype=jnp.float32))
    A = A / jnp.max(jnp.abs(jnp.linalg.eigvalsh(A)))
    S = A.astype(dtype)

    # Node-variant graph filter parameters: h_l of shape (F_out, K_l, F_in, N)
    nvgf_params = []
    kidx = 1
    for l in range(len(nShiftTaps)):
        Fin, Fout, K = dimNodeSignals[l], dimNodeSignals[l + 1], nShiftTaps[l]
        h = 0.1 * jax.random.normal(keys[kidx], (Fout, K, Fin, N), dtype=dtype)
        bflt = 0.1 * jax.random.normal(keys[kidx + 1], (Fout, 1), dtype=dtype)
        nvgf_params.append((h, bflt))
        kidx += 2

    # Local readout parameters: Linear(F[-1] -> dimReadout[0]) -> ReLU -> ...
    readout_params = []
    fin = dimNodeSignals[-1]
    for r in dimReadout:
        w = 0.1 * jax.random.normal(keys[kidx], (r, fin), dtype=dtype)
        brd = 0.1 * jax.random.normal(keys[kidx + 1], (r, 1), dtype=dtype)
        readout_params.append((w, brd))
        fin = r
        kidx += 2

    # Input: batchSize x timeSamples x dimFeatures x numberNodes
    x = jax.random.normal(keys[kidx], (B, T, dimNodeSignals[0], N), dtype=dtype)

    # Build once (all layout plumbing hoisted here), then run the fused kernel.
    fwd = make_local_node_variant_t(S, nvgf_params, readout_params,
                                    batch=B, time=T, dtype=dtype)
    y = jax.block_until_ready(fwd(x))

    y_ref = reference_forward(x, S, nvgf_params, readout_params)
    assert y.shape == (B, T, dimReadout[-1], N)
    np.testing.assert_allclose(np.asarray(y), np.asarray(y_ref), rtol=1e-4, atol=1e-4)

    print("KERNEL_OK")
</pallas_src>

<mosaic_0001>
module attributes {stable_mosaic.version = 11 : i64} {
  func.func @_fused_forward_kernel(%arg0: i32, %arg1: memref<3x256xf32, #tpu.memory_space<vmem>>, %arg2: memref<256x512xf32, #tpu.memory_space<vmem>>, %arg3: memref<3x3x8x256xf32, #tpu.memory_space<vmem>>, %arg4: memref<8x256xf32, #tpu.memory_space<vmem>>, %arg5: memref<2x8x4x256xf32, #tpu.memory_space<vmem>>, %arg6: memref<4x256xf32, #tpu.memory_space<vmem>>, %arg7: memref<4x6x256xf32, #tpu.memory_space<vmem>>, %arg8: memref<6x256xf32, #tpu.memory_space<vmem>>, %arg9: memref<6x2x256xf32, #tpu.memory_space<vmem>>, %arg10: memref<2x256xf32, #tpu.memory_space<vmem>>, %arg11: memref<2x256xf32, #tpu.memory_space<vmem>>) attributes {dimension_semantics = [#tpu.dimension_semantics<parallel>], iteration_bounds = array<i64: 1>, scalar_prefetch = 0 : i64, scratch_operands = 0 : i64, tpu.core_type = #tpu.core_type<tc>, window_params = [{transform_indices = @transform_0, window_bounds = array<i64: 3, 256>}, {pipeline_mode = #tpu.pipeline_mode<synchronous>, transform_indices = @transform_1, window_bounds = array<i64: 256, 512>}, {pipeline_mode = #tpu.pipeline_mode<synchronous>, transform_indices = @transform_2, window_bounds = array<i64: 3, 3, 8, 256>}, {pipeline_mode = #tpu.pipeline_mode<synchronous>, transform_indices = @transform_3, window_bounds = array<i64: 8, 256>}, {pipeline_mode = #tpu.pipeline_mode<synchronous>, transform_indices = @transform_4, window_bounds = array<i64: 2, 8, 4, 256>}, {pipeline_mode = #tpu.pipeline_mode<synchronous>, transform_indices = @transform_5, window_bounds = array<i64: 4, 256>}, {pipeline_mode = #tpu.pipeline_mode<synchronous>, transform_indices = @transform_6, window_bounds = array<i64: 4, 6, 256>}, {pipeline_mode = #tpu.pipeline_mode<synchronous>, transform_indices = @transform_7, window_bounds = array<i64: 6, 256>}, {pipeline_mode = #tpu.pipeline_mode<synchronous>, transform_indices = @transform_8, window_bounds = array<i64: 6, 2, 256>}, {pipeline_mode = #tpu.pipeline_mode<synchronous>, transform_indices = @transform_9, window_bounds = array<i64: 2, 256>}, {transform_indices = @transform_10, window_bounds = array<i64: 2, 256>}]} {
    %c0 = arith.constant 0 : index
    %c0_0 = arith.constant 0 : index
    %0 = vector.load %arg1[%c0, %c0_0] : memref<3x256xf32, #tpu.memory_space<vmem>>, vector<3x256xf32>
    %c0_1 = arith.constant 0 : index
    %c0_2 = arith.constant 0 : index
    %1 = vector.load %arg4[%c0_1, %c0_2] : memref<8x256xf32, #tpu.memory_space<vmem>>, vector<8x256xf32>
    %c0_3 = arith.constant 0 : index
    %c0_4 = arith.constant 0 : index
    %c0_5 = arith.constant 0 : index
    %c0_6 = arith.constant 0 : index
    %2 = vector.load %arg3[%c0_3, %c0_4, %c0_5, %c0_6] : memref<3x3x8x256xf32, #tpu.memory_space<vmem>>, vector<1x1x8x256xf32>
    %3 = vector.shape_cast %2 : vector<1x1x8x256xf32> to vector<8x256xf32>
    %4 = vector.extract_strided_slice %0 {offsets = [0, 0], sizes = [1, 256], strides = [1, 1]} : vector<3x256xf32> to vector<1x256xf32>
    %5 = vector.broadcast %4 : vector<1x256xf32> to vector<8x256xf32>
    %6 = arith.mulf %3, %5 : vector<8x256xf32>
    %7 = arith.addf %1, %6 : vector<8x256xf32>
    %c0_7 = arith.constant 0 : index
    %c1 = arith.constant 1 : index
    %c0_8 = arith.constant 0 : index
    %c0_9 = arith.constant 0 : index
    %8 = vector.load %arg3[%c0_7, %c1, %c0_8, %c0_9] : memref<3x3x8x256xf32, #tpu.memory_space<vmem>>, vector<1x1x8x256xf32>
    %9 = vector.shape_cast %8 : vector<1x1x8x256xf32> to vector<8x256xf32>
    %10 = vector.extract_strided_slice %0 {offsets = [1, 0], sizes = [1, 256], strides = [1, 1]} : vector<3x256xf32> to vector<1x256xf32>
    %11 = vector.broadcast %10 : vector<1x256xf32> to vector<8x256xf32>
    %12 = arith.mulf %9, %11 : vector<8x256xf32>
    %13 = arith.addf %7, %12 : vector<8x256xf32>
    %c0_10 = arith.constant 0 : index
    %c2 = arith.constant 2 : index
    %c0_11 = arith.constant 0 : index
    %c0_12 = arith.constant 0 : index
    %14 = vector.load %arg3[%c0_10, %c2, %c0_11, %c0_12] : memref<3x3x8x256xf32, #tpu.memory_space<vmem>>, vector<1x1x8x256xf32>
    %15 = vector.shape_cast %14 : vector<1x1x8x256xf32> to vector<8x256xf32>
    %16 = vector.extract_strided_slice %0 {offsets = [2, 0], sizes = [1, 256], strides = [1, 1]} : vector<3x256xf32> to vector<1x256xf32>
    %17 = vector.broadcast %16 : vector<1x256xf32> to vector<8x256xf32>
    %18 = arith.mulf %15, %17 : vector<8x256xf32>
    %19 = arith.addf %13, %18 : vector<8x256xf32>
    %c0_13 = arith.constant 0 : index
    %c0_14 = arith.constant 0 : index
    %20 = vector.load %arg2[%c0_13, %c0_14] : memref<256x512xf32, #tpu.memory_space<vmem>>, vector<256x512xf32>
    %cst = arith.constant dense<0.000000e+00> : vector<3x512xf32>
    %21 = tpu.matmul %0, %20, %cst {dimension_numbers = #tpu.dot_dimension_numbers<[1], [0], [0], [1], [0, 0, 1, 1], [], []>} : vector<3x256xf32>, vector<256x512xf32>, vector<3x512xf32> -> vector<3x512xf32>
    %22 = vector.extract_strided_slice %21 {offsets = [0, 0], sizes = [3, 256], strides = [1, 1]} : vector<3x512xf32> to vector<3x256xf32>
    %c1_15 = arith.constant 1 : index
    %c0_16 = arith.constant 0 : index
    %c0_17 = arith.constant 0 : index
    %c0_18 = arith.constant 0 : index
    %23 = vector.load %arg3[%c1_15, %c0_16, %c0_17, %c0_18] : memref<3x3x8x256xf32, #tpu.memory_space<vmem>>, vector<1x1x8x256xf32>
    %24 = vector.shape_cast %23 : vector<1x1x8x256xf32> to vector<8x256xf32>
    %25 = vector.extract_strided_slice %22 {offsets = [0, 0], sizes = [1, 256], strides = [1, 1]} : vector<3x256xf32> to vector<1x256xf32>
    %26 = vector.broadcast %25 : vector<1x256xf32> to vector<8x256xf32>
    %27 = arith.mulf %24, %26 : vector<8x256xf32>
    %28 = arith.addf %19, %27 : vector<8x256xf32>
    %c1_19 = arith.constant 1 : index
    %c1_20 = arith.constant 1 : index
    %c0_21 = arith.constant 0 : index
    %c0_22 = arith.constant 0 : index
    %29 = vector.load %arg3[%c1_19, %c1_20, %c0_21, %c0_22] : memref<3x3x8x256xf32, #tpu.memory_space<vmem>>, vector<1x1x8x256xf32>
    %30 = vector.shape_cast %29 : vector<1x1x8x256xf32> to vector<8x256xf32>
    %31 = vector.extract_strided_slice %22 {offsets = [1, 0], sizes = [1, 256], strides = [1, 1]} : vector<3x256xf32> to vector<1x256xf32>
    %32 = vector.broadcast %31 : vector<1x256xf32> to vector<8x256xf32>
    %33 = arith.mulf %30, %32 : vector<8x256xf32>
    %34 = arith.addf %28, %33 : vector<8x256xf32>
    %c1_23 = arith.constant 1 : index
    %c2_24 = arith.constant 2 : index
    %c0_25 = arith.constant 0 : index
    %c0_26 = arith.constant 0 : index
    %35 = vector.load %arg3[%c1_23, %c2_24, %c0_25, %c0_26] : memref<3x3x8x256xf32, #tpu.memory_space<vmem>>, vector<1x1x8x256xf32>
    %36 = vector.shape_cast %35 : vector<1x1x8x256xf32> to vector<8x256xf32>
    %37 = vector.extract_strided_slice %22 {offsets = [2, 0], sizes = [1, 256], strides = [1, 1]} : vector<3x256xf32> to vector<1x256xf32>
    %38 = vector.broadcast %37 : vector<1x256xf32> to vector<8x256xf32>
    %39 = arith.mulf %36, %38 : vector<8x256xf32>
    %40 = arith.addf %34, %39 : vector<8x256xf32>
    %41 = vector.extract_strided_slice %21 {offsets = [0, 256], sizes = [3, 256], strides = [1, 1]} : vector<3x512xf32> to vector<3x256xf32>
    %c2_27 = arith.constant 2 : index
    %c0_28 = arith.constant 0 : index
    %c0_29 = arith.constant 0 : index
    %c0_30 = arith.constant 0 : index
    %42 = vector.load %arg3[%c2_27, %c0_28, %c0_29, %c0_30] : memref<3x3x8x256xf32, #tpu.memory_space<vmem>>, vector<1x1x8x256xf32>
    %43 = vector.shape_cast %42 : vector<1x1x8x256xf32> to vector<8x256xf32>
    %44 = vector.extract_strided_slice %41 {offsets = [0, 0], sizes = [1, 256], strides = [1, 1]} : vector<3x256xf32> to vector<1x256xf32>
    %45 = vector.broadcast %44 : vector<1x256xf32> to vector<8x256xf32>
    %46 = arith.mulf %43, %45 : vector<8x256xf32>
    %47 = arith.addf %40, %46 : vector<8x256xf32>
    %c2_31 = arith.constant 2 : index
    %c1_32 = arith.constant 1 : index
    %c0_33 = arith.constant 0 : index
    %c0_34 = arith.constant 0 : index
    %48 = vector.load %arg3[%c2_31, %c1_32, %c0_33, %c0_34] : memref<3x3x8x256xf32, #tpu.memory_space<vmem>>, vector<1x1x8x256xf32>
    %49 = vector.shape_cast %48 : vector<1x1x8x256xf32> to vector<8x256xf32>
    %50 = vector.extract_strided_slice %41 {offsets = [1, 0], sizes = [1, 256], strides = [1, 1]} : vector<3x256xf32> to vector<1x256xf32>
    %51 = vector.broadcast %50 : vector<1x256xf32> to vector<8x256xf32>
    %52 = arith.mulf %49, %51 : vector<8x256xf32>
    %53 = arith.addf %47, %52 : vector<8x256xf32>
    %c2_35 = arith.constant 2 : index
    %c2_36 = arith.constant 2 : index
    %c0_37 = arith.constant 0 : index
    %c0_38 = arith.constant 0 : index
    %54 = vector.load %arg3[%c2_35, %c2_36, %c0_37, %c0_38] : memref<3x3x8x256xf32, #tpu.memory_space<vmem>>, vector<1x1x8x256xf32>
    %55 = vector.shape_cast %54 : vector<1x1x8x256xf32> to vector<8x256xf32>
    %56 = vector.extract_strided_slice %41 {offsets = [2, 0], sizes = [1, 256], strides = [1, 1]} : vector<3x256xf32> to vector<1x256xf32>
    %57 = vector.broadcast %56 : vector<1x256xf32> to vector<8x256xf32>
    %58 = arith.mulf %55, %57 : vector<8x256xf32>
    %59 = arith.addf %53, %58 : vector<8x256xf32>
    %cst_39 = arith.constant 0.000000e+00 : f32
    %60 = vector.broadcast %cst_39 : f32 to vector<8x256xf32>
    %61 = arith.maximumf %59, %60 : vector<8x256xf32>
    %c0_40 = arith.constant 0 : index
    %c0_41 = arith.constant 0 : index
    %62 = vector.load %arg6[%c0_40, %c0_41] : memref<4x256xf32, #tpu.memory_space<vmem>>, vector<4x256xf32>
    %c0_42 = arith.constant 0 : index
    %c0_43 = arith.constant 0 : index
    %c0_44 = arith.constant 0 : index
    %c0_45 = arith.constant 0 : index
    %63 = vector.load %arg5[%c0_42, %c0_43, %c0_44, %c0_45] : memref<2x8x4x256xf32, #tpu.memory_space<vmem>>, vector<1x1x4x256xf32>
    %64 = vector.shape_cast %63 : vector<1x1x4x256xf32> to vector<4x256xf32>
    %65 = vector.extract_strided_slice %61 {offsets = [0, 0], sizes = [1, 256], strides = [1, 1]} : vector<8x256xf32> to vector<1x256xf32>
    %66 = vector.broadcast %65 : vector<1x256xf32> to vector<4x256xf32>
    %67 = arith.mulf %64, %66 : vector<4x256xf32>
    %68 = arith.addf %62, %67 : vector<4x256xf32>
    %c0_46 = arith.constant 0 : index
    %c1_47 = arith.constant 1 : index
    %c0_48 = arith.constant 0 : index
    %c0_49 = arith.constant 0 : index
    %69 = vector.load %arg5[%c0_46, %c1_47, %c0_48, %c0_49] : memref<2x8x4x256xf32, #tpu.memory_space<vmem>>, vector<1x1x4x256xf32>
    %70 = vector.shape_cast %69 : vector<1x1x4x256xf32> to vector<4x256xf32>
    %71 = vector.extract_strided_slice %61 {offsets = [1, 0], sizes = [1, 256], strides = [1, 1]} : vector<8x256xf32> to vector<1x256xf32>
    %72 = vector.broadcast %71 : vector<1x256xf32> to vector<4x256xf32>
    %73 = arith.mulf %70, %72 : vector<4x256xf32>
    %74 = arith.addf %68, %73 : vector<4x256xf32>
    %c0_50 = arith.constant 0 : index
    %c2_51 = arith.constant 2 : index
    %c0_52 = arith.constant 0 : index
    %c0_53 = arith.constant 0 : index
    %75 = vector.load %arg5[%c0_50, %c2_51, %c0_52, %c0_53] : memref<2x8x4x256xf32, #tpu.memory_space<vmem>>, vector<1x1x4x256xf32>
    %76 = vector.shape_cast %75 : vector<1x1x4x256xf32> to vector<4x256xf32>
    %77 = vector.extract_strided_slice %61 {offsets = [2, 0], sizes = [1, 256], strides = [1, 1]} : vector<8x256xf32> to vector<1x256xf32>
    %78 = vector.broadcast %77 : vector<1x256xf32> to vector<4x256xf32>
    %79 = arith.mulf %76, %78 : vector<4x256xf32>
    %80 = arith.addf %74, %79 : vector<4x256xf32>
    %c0_54 = arith.constant 0 : index
    %c3 = arith.constant 3 : index
    %c0_55 = arith.constant 0 : index
    %c0_56 = arith.constant 0 : index
    %81 = vector.load %arg5[%c0_54, %c3, %c0_55, %c0_56] : memref<2x8x4x256xf32, #tpu.memory_space<vmem>>, vector<1x1x4x256xf32>
    %82 = vector.shape_cast %81 : vector<1x1x4x256xf32> to vector<4x256xf32>
    %83 = vector.extract_strided_slice %61 {offsets = [3, 0], sizes = [1, 256], strides = [1, 1]} : vector<8x256xf32> to vector<1x256xf32>
    %84 = vector.broadcast %83 : vector<1x256xf32> to vector<4x256xf32>
    %85 = arith.mulf %82, %84 : vector<4x256xf32>
    %86 = arith.addf %80, %85 : vector<4x256xf32>
    %c0_57 = arith.constant 0 : index
    %c4 = arith.constant 4 : index
    %c0_58 = arith.constant 0 : index
    %c0_59 = arith.constant 0 : index
    %87 = vector.load %arg5[%c0_57, %c4, %c0_58, %c0_59] : memref<2x8x4x256xf32, #tpu.memory_space<vmem>>, vector<1x1x4x256xf32>
    %88 = vector.shape_cast %87 : vector<1x1x4x256xf32> to vector<4x256xf32>
    %89 = vector.extract_strided_slice %61 {offsets = [4, 0], sizes = [1, 256], strides = [1, 1]} : vector<8x256xf32> to vector<1x256xf32>
    %90 = vector.broadcast %89 : vector<1x256xf32> to vector<4x256xf32>
    %91 = arith.mulf %88, %90 : vector<4x256xf32>
    %92 = arith.addf %86, %91 : vector<4x256xf32>
    %c0_60 = arith.constant 0 : index
    %c5 = arith.constant 5 : index
    %c0_61 = arith.constant 0 : index
    %c0_62 = arith.constant 0 : index
    %93 = vector.load %arg5[%c0_60, %c5, %c0_61, %c0_62] : memref<2x8x4x256xf32, #tpu.memory_space<vmem>>, vector<1x1x4x256xf32>
    %94 = vector.shape_cast %93 : vector<1x1x4x256xf32> to vector<4x256xf32>
    %95 = vector.extract_strided_slice %61 {offsets = [5, 0], sizes = [1, 256], strides = [1, 1]} : vector<8x256xf32> to vector<1x256xf32>
    %96 = vector.broadcast %95 : vector<1x256xf32> to vector<4x256xf32>
    %97 = arith.mulf %94, %96 : vector<4x256xf32>
    %98 = arith.addf %92, %97 : vector<4x256xf32>
    %c0_63 = arith.constant 0 : index
    %c6 = arith.constant 6 : index
    %c0_64 = arith.constant 0 : index
    %c0_65 = arith.constant 0 : index
    %99 = vector.load %arg5[%c0_63, %c6, %c0_64, %c0_65] : memref<2x8x4x256xf32, #tpu.memory_space<vmem>>, vector<1x1x4x256xf32>
    %100 = vector.shape_cast %99 : vector<1x1x4x256xf32> to vector<4x256xf32>
    %101 = vector.extract_strided_slice %61 {offsets = [6, 0], sizes = [1, 256], strides = [1, 1]} : vector<8x256xf32> to vector<1x256xf32>
    %102 = vector.broadcast %101 : vector<1x256xf32> to vector<4x256xf32>
    %103 = arith.mulf %100, %102 : vector<4x256xf32>
    %104 = arith.addf %98, %103 : vector<4x256xf32>
    %c0_66 = arith.constant 0 : index
    %c7 = arith.constant 7 : index
    %c0_67 = arith.constant 0 : index
    %c0_68 = arith.constant 0 : index
    %105 = vector.load %arg5[%c0_66, %c7, %c0_67, %c0_68] : memref<2x8x4x256xf32, #tpu.memory_space<vmem>>, vector<1x1x4x256xf32>
    %106 = vector.shape_cast %105 : vector<1x1x4x256xf32> to vector<4x256xf32>
    %107 = vector.extract_strided_slice %61 {offsets = [7, 0], sizes = [1, 256], strides = [1, 1]} : vector<8x256xf32> to vector<1x256xf32>
    %108 = vector.broadcast %107 : vector<1x256xf32> to vector<4x256xf32>
    %109 = arith.mulf %106, %108 : vector<4x256xf32>
    %110 = arith.addf %104, %109 : vector<4x256xf32>
    %c0_69 = arith.constant 0 : index
    %c0_70 = arith.constant 0 : index
    %111 = vector.load %arg2[%c0_69, %c0_70] : memref<256x512xf32, #tpu.memory_space<vmem>>, vector<256x256xf32>
    %cst_71 = arith.constant dense<0.000000e+00> : vector<8x256xf32>
    %112 = tpu.matmul %61, %111, %cst_71 {dimension_numbers = #tpu.dot_dimension_numbers<[1], [0], [0], [1], [0, 0, 1, 1], [], []>} : vector<8x256xf32>, vector<256x256xf32>, vector<8x256xf32> -> vector<8x256xf32>
    %c1_72 = arith.constant 1 : index
    %c0_73 = arith.constant 0 : index
    %c0_74 = arith.constant 0 : index
    %c0_75 = arith.constant 0 : index
    %113 = vector.load %arg5[%c1_72, %c0_73, %c0_74, %c0_75] : memref<2x8x4x256xf32, #tpu.memory_space<vmem>>, vector<1x1x4x256xf32>
    %114 = vector.shape_cast %113 : vector<1x1x4x256xf32> to vector<4x256xf32>
    %115 = vector.extract_strided_slice %112 {offsets = [0, 0], sizes = [1, 256], strides = [1, 1]} : vector<8x256xf32> to vector<1x256xf32>
    %116 = vector.broadcast %115 : vector<1x256xf32> to vector<4x256xf32>
    %117 = arith.mulf %114, %116 : vector<4x256xf32>
    %118 = arith.addf %110, %117 : vector<4x256xf32>
    %c1_76 = arith.constant 1 : index
    %c1_77 = arith.constant 1 : index
    %c0_78 = arith.constant 0 : index
    %c0_79 = arith.constant 0 : index
    %119 = vector.load %arg5[%c1_76, %c1_77, %c0_78, %c0_79] : memref<2x8x4x256xf32, #tpu.memory_space<vmem>>, vector<1x1x4x256xf32>
    %120 = vector.shape_cast %119 : vector<1x1x4x256xf32> to vector<4x256xf32>
    %121 = vector.extract_strided_slice %112 {offsets = [1, 0], sizes = [1, 256], strides = [1, 1]} : vector<8x256xf32> to vector<1x256xf32>
    %122 = vector.broadcast %121 : vector<1x256xf32> to vector<4x256xf32>
    %123 = arith.mulf %120, %122 : vector<4x256xf32>
    %124 = arith.addf %118, %123 : vector<4x256xf32>
    %c1_80 = arith.constant 1 : index
    %c2_81 = arith.constant 2 : index
    %c0_82 = arith.constant 0 : index
    %c0_83 = arith.constant 0 : index
    %125 = vector.load %arg5[%c1_80, %c2_81, %c0_82, %c0_83] : memref<2x8x4x256xf32, #tpu.memory_space<vmem>>, vector<1x1x4x256xf32>
    %126 = vector.shape_cast %125 : vector<1x1x4x256xf32> to vector<4x256xf32>
    %127 = vector.extract_strided_slice %112 {offsets = [2, 0], sizes = [1, 256], strides = [1, 1]} : vector<8x256xf32> to vector<1x256xf32>
    %128 = vector.broadcast %127 : vector<1x256xf32> to vector<4x256xf32>
    %129 = arith.mulf %126, %128 : vector<4x256xf32>
    %130 = arith.addf %124, %129 : vector<4x256xf32>
    %c1_84 = arith.constant 1 : index
    %c3_85 = arith.constant 3 : index
    %c0_86 = arith.constant 0 : index
    %c0_87 = arith.constant 0 : index
    %131 = vector.load %arg5[%c1_84, %c3_85, %c0_86, %c0_87] : memref<2x8x4x256xf32, #tpu.memory_space<vmem>>, vector<1x1x4x256xf32>
    %132 = vector.shape_cast %131 : vector<1x1x4x256xf32> to vector<4x256xf32>
    %133 = vector.extract_strided_slice %112 {offsets = [3, 0], sizes = [1, 256], strides = [1, 1]} : vector<8x256xf32> to vector<1x256xf32>
    %134 = vector.broadcast %133 : vector<1x256xf32> to vector<4x256xf32>
    %135 = arith.mulf %132, %134 : vector<4x256xf32>
    %136 = arith.addf %130, %135 : vector<4x256xf32>
    %c1_88 = arith.constant 1 : index
    %c4_89 = arith.constant 4 : index
    %c0_90 = arith.constant 0 : index
    %c0_91 = arith.constant 0 : index
    %137 = vector.load %arg5[%c1_88, %c4_89, %c0_90, %c0_91] : memref<2x8x4x256xf32, #tpu.memory_space<vmem>>, vector<1x1x4x256xf32>
    %138 = vector.shape_cast %137 : vector<1x1x4x256xf32> to vector<4x256xf32>
    %139 = vector.extract_strided_slice %112 {offsets = [4, 0], sizes = [1, 256], strides = [1, 1]} : vector<8x256xf32> to vector<1x256xf32>
    %140 = vector.broadcast %139 : vector<1x256xf32> to vector<4x256xf32>
    %141 = arith.mulf %138, %140 : vector<4x256xf32>
    %142 = arith.addf %136, %141 : vector<4x256xf32>
    %c1_92 = arith.constant 1 : index
    %c5_93 = arith.constant 5 : index
    %c0_94 = arith.constant 0 : index
    %c0_95 = arith.constant 0 : index
    %143 = vector.load %arg5[%c1_92, %c5_93, %c0_94, %c0_95] : memref<2x8x4x256xf32, #tpu.memory_space<vmem>>, vector<1x1x4x256xf32>
    %144 = vector.shape_cast %143 : vector<1x1x4x256xf32> to vector<4x256xf32>
    %145 = vector.extract_strided_slice %112 {offsets = [5, 0], sizes = [1, 256], strides = [1, 1]} : vector<8x256xf32> to vector<1x256xf32>
    %146 = vector.broadcast %145 : vector<1x256xf32> to vector<4x256xf32>
    %147 = arith.mulf %144, %146 : vector<4x256xf32>
    %148 = arith.addf %142, %147 : vector<4x256xf32>
    %c1_96 = arith.constant 1 : index
    %c6_97 = arith.constant 6 : index
    %c0_98 = arith.constant 0 : index
    %c0_99 = arith.constant 0 : index
    %149 = vector.load %arg5[%c1_96, %c6_97, %c0_98, %c0_99] : memref<2x8x4x256xf32, #tpu.memory_space<vmem>>, vector<1x1x4x256xf32>
    %150 = vector.shape_cast %149 : vector<1x1x4x256xf32> to vector<4x256xf32>
    %151 = vector.extract_strided_slice %112 {offsets = [6, 0], sizes = [1, 256], strides = [1, 1]} : vector<8x256xf32> to vector<1x256xf32>
    %152 = vector.broadcast %151 : vector<1x256xf32> to vector<4x256xf32>
    %153 = arith.mulf %150, %152 : vector<4x256xf32>
    %154 = arith.addf %148, %153 : vector<4x256xf32>
    %c1_100 = arith.constant 1 : index
    %c7_101 = arith.constant 7 : index
    %c0_102 = arith.constant 0 : index
    %c0_103 = arith.constant 0 : index
    %155 = vector.load %arg5[%c1_100, %c7_101, %c0_102, %c0_103] : memref<2x8x4x256xf32, #tpu.memory_space<vmem>>, vector<1x1x4x256xf32>
    %156 = vector.shape_cast %155 : vector<1x1x4x256xf32> to vector<4x256xf32>
    %157 = vector.extract_strided_slice %112 {offsets = [7, 0], sizes = [1, 256], strides = [1, 1]} : vector<8x256xf32> to vector<1x256xf32>
    %158 = vector.broadcast %157 : vector<1x256xf32> to vector<4x256xf32>
    %159 = arith.mulf %156, %158 : vector<4x256xf32>
    %160 = arith.addf %154, %159 : vector<4x256xf32>
    %cst_104 = arith.constant 0.000000e+00 : f32
    %161 = vector.broadcast %cst_104 : f32 to vector<4x256xf32>
    %162 = arith.maximumf %160, %161 : vector<4x256xf32>
    %c0_105 = arith.constant 0 : index
    %c0_106 = arith.constant 0 : index
    %163 = vector.load %arg8[%c0_105, %c0_106] : memref<6x256xf32, #tpu.memory_space<vmem>>, vector<6x256xf32>
    %c0_107 = arith.constant 0 : index
    %c0_108 = arith.constant 0 : index
    %c0_109 = arith.constant 0 : index
    %164 = vector.load %arg7[%c0_107, %c0_108, %c0_109] : memref<4x6x256xf32, #tpu.memory_space<vmem>>, vector<1x6x256xf32>
    %165 = vector.shape_cast %164 : vector<1x6x256xf32> to vector<6x256xf32>
    %166 = vector.extract_strided_slice %162 {offsets = [0, 0], sizes = [1, 256], strides = [1, 1]} : vector<4x256xf32> to vector<1x256xf32>
    %167 = vector.broadcast %166 : vector<1x256xf32> to vector<6x256xf32>
    %168 = arith.mulf %165, %167 : vector<6x256xf32>
    %169 = arith.addf %163, %168 : vector<6x256xf32>
    %c1_110 = arith.constant 1 : index
    %c0_111 = arith.constant 0 : index
    %c0_112 = arith.constant 0 : index
    %170 = vector.load %arg7[%c1_110, %c0_111, %c0_112] : memref<4x6x256xf32, #tpu.memory_space<vmem>>, vector<1x6x256xf32>
    %171 = vector.shape_cast %170 : vector<1x6x256xf32> to vector<6x256xf32>
    %172 = vector.extract_strided_slice %162 {offsets = [1, 0], sizes = [1, 256], strides = [1, 1]} : vector<4x256xf32> to vector<1x256xf32>
    %173 = vector.broadcast %172 : vector<1x256xf32> to vector<6x256xf32>
    %174 = arith.mulf %171, %173 : vector<6x256xf32>
    %175 = arith.addf %169, %174 : vector<6x256xf32>
    %c2_113 = arith.constant 2 : index
    %c0_114 = arith.constant 0 : index
    %c0_115 = arith.constant 0 : index
    %176 = vector.load %arg7[%c2_113, %c0_114, %c0_115] : memref<4x6x256xf32, #tpu.memory_space<vmem>>, vector<1x6x256xf32>
    %177 = vector.shape_cast %176 : vector<1x6x256xf32> to vector<6x256xf32>
    %178 = vector.extract_strided_slice %162 {offsets = [2, 0], sizes = [1, 256], strides = [1, 1]} : vector<4x256xf32> to vector<1x256xf32>
    %179 = vector.broadcast %178 : vector<1x256xf32> to vector<6x256xf32>
    %180 = arith.mulf %177, %179 : vector<6x256xf32>
    %181 = arith.addf %175, %180 : vector<6x256xf32>
    %c3_116 = arith.constant 3 : index
    %c0_117 = arith.constant 0 : index
    %c0_118 = arith.constant 0 : index
    %182 = vector.load %arg7[%c3_116, %c0_117, %c0_118] : memref<4x6x256xf32, #tpu.memory_space<vmem>>, vector<1x6x256xf32>
    %183 = vector.shape_cast %182 : vector<1x6x256xf32> to vector<6x256xf32>
    %184 = vector.extract_strided_slice %162 {offsets = [3, 0], sizes = [1, 256], strides = [1, 1]} : vector<4x256xf32> to vector<1x256xf32>
    %185 = vector.broadcast %184 : vector<1x256xf32> to vector<6x256xf32>
    %186 = arith.mulf %183, %185 : vector<6x256xf32>
    %187 = arith.addf %181, %186 : vector<6x256xf32>
    %cst_119 = arith.constant 0.000000e+00 : f32
    %188 = vector.broadcast %cst_119 : f32 to vector<6x256xf32>
    %189 = arith.maximumf %187, %188 : vector<6x256xf32>
    %c0_120 = arith.constant 0 : index
    %c0_121 = arith.constant 0 : index
    %190 = vector.load %arg10[%c0_120, %c0_121] : memref<2x256xf32, #tpu.memory_space<vmem>>, vector<2x256xf32>
    %c0_122 = arith.constant 0 : index
    %c0_123 = arith.constant 0 : index
    %c0_124 = arith.constant 0 : index
    %191 = vector.load %arg9[%c0_122, %c0_123, %c0_124] : memref<6x2x256xf32, #tpu.memory_space<vmem>>, vector<1x2x256xf32>
    %192 = vector.shape_cast %191 : vector<1x2x256xf32> to vector<2x256xf32>
    %193 = vector.extract_strided_slice %189 {offsets = [0, 0], sizes = [1, 256], strides = [1, 1]} : vector<6x256xf32> to vector<1x256xf32>
    %194 = vector.broadcast %193 : vector<1x256xf32> to vector<2x256xf32>
    %195 = arith.mulf %192, %194 : vector<2x256xf32>
    %196 = arith.addf %190, %195 : vector<2x256xf32>
    %c1_125 = arith.constant 1 : index
    %c0_126 = arith.constant 0 : index
    %c0_127 = arith.constant 0 : index
    %197 = vector.load %arg9[%c1_125, %c0_126, %c0_127] : memref<6x2x256xf32, #tpu.memory_space<vmem>>, vector<1x2x256xf32>
    %198 = vector.shape_cast %197 : vector<1x2x256xf32> to vector<2x256xf32>
    %199 = vector.extract_strided_slice %189 {offsets = [1, 0], sizes = [1, 256], strides = [1, 1]} : vector<6x256xf32> to vector<1x256xf32>
    %200 = vector.broadcast %199 : vector<1x256xf32> to vector<2x256xf32>
    %201 = arith.mulf %198, %200 : vector<2x256xf32>
    %202 = arith.addf %196, %201 : vector<2x256xf32>
    %c2_128 = arith.constant 2 : index
    %c0_129 = arith.constant 0 : index
    %c0_130 = arith.constant 0 : index
    %203 = vector.load %arg9[%c2_128, %c0_129, %c0_130] : memref<6x2x256xf32, #tpu.memory_space<vmem>>, vector<1x2x256xf32>
    %204 = vector.shape_cast %203 : vector<1x2x256xf32> to vector<2x256xf32>
    %205 = vector.extract_strided_slice %189 {offsets = [2, 0], sizes = [1, 256], strides = [1, 1]} : vector<6x256xf32> to vector<1x256xf32>
    %206 = vector.broadcast %205 : vector<1x256xf32> to vector<2x256xf32>
    %207 = arith.mulf %204, %206 : vector<2x256xf32>
    %208 = arith.addf %202, %207 : vector<2x256xf32>
    %c3_131 = arith.constant 3 : index
    %c0_132 = arith.constant 0 : index
    %c0_133 = arith.constant 0 : index
    %209 = vector.load %arg9[%c3_131, %c0_132, %c0_133] : memref<6x2x256xf32, #tpu.memory_space<vmem>>, vector<1x2x256xf32>
    %210 = vector.shape_cast %209 : vector<1x2x256xf32> to vector<2x256xf32>
    %211 = vector.extract_strided_slice %189 {offsets = [3, 0], sizes = [1, 256], strides = [1, 1]} : vector<6x256xf32> to vector<1x256xf32>
    %212 = vector.broadcast %211 : vector<1x256xf32> to vector<2x256xf32>
    %213 = arith.mulf %210, %212 : vector<2x256xf32>
    %214 = arith.addf %208, %213 : vector<2x256xf32>
    %c4_134 = arith.constant 4 : index
    %c0_135 = arith.constant 0 : index
    %c0_136 = arith.constant 0 : index
    %215 = vector.load %arg9[%c4_134, %c0_135, %c0_136] : memref<6x2x256xf32, #tpu.memory_space<vmem>>, vector<1x2x256xf32>
    %216 = vector.shape_cast %215 : vector<1x2x256xf32> to vector<2x256xf32>
    %217 = vector.extract_strided_slice %189 {offsets = [4, 0], sizes = [1, 256], strides = [1, 1]} : vector<6x256xf32> to vector<1x256xf32>
    %218 = vector.broadcast %217 : vector<1x256xf32> to vector<2x256xf32>
    %219 = arith.mulf %216, %218 : vector<2x256xf32>
    %220 = arith.addf %214, %219 : vector<2x256xf32>
    %c5_137 = arith.constant 5 : index
    %c0_138 = arith.constant 0 : index
    %c0_139 = arith.constant 0 : index
    %221 = vector.load %arg9[%c5_137, %c0_138, %c0_139] : memref<6x2x256xf32, #tpu.memory_space<vmem>>, vector<1x2x256xf32>
    %222 = vector.shape_cast %221 : vector<1x2x256xf32> to vector<2x256xf32>
    %223 = vector.extract_strided_slice %189 {offsets = [5, 0], sizes = [1, 256], strides = [1, 1]} : vector<6x256xf32> to vector<1x256xf32>
    %224 = vector.broadcast %223 : vector<1x256xf32> to vector<2x256xf32>
    %225 = arith.mulf %222, %224 : vector<2x256xf32>
    %226 = arith.addf %220, %225 : vector<2x256xf32>
    %c0_140 = arith.constant 0 : index
    %c0_141 = arith.constant 0 : index
    %227 = vector.load %arg11[%c0_140, %c0_141] : memref<2x256xf32, #tpu.memory_space<vmem>>, vector<2x256xf32>
    tpu.vector_store %arg11[%c0_140, %c0_141], %226 {strides = array<i32>} : memref<2x256xf32, #tpu.memory_space<vmem>>, vector<2x256xf32>,
    return
  }
  func.func @transform_0(%arg0: i32) -> (i32, i32) {
    %c0_i32 = arith.constant 0 : i32
    %c0_i32_0 = arith.constant 0 : i32
    return %c0_i32, %arg0 : i32, i32
  }
  func.func @transform_1(%arg0: i32) -> (i32, i32) {
    %c0_i32 = arith.constant 0 : i32
    %c0_i32_0 = arith.constant 0 : i32
    %c0_i32_1 = arith.constant 0 : i32
    return %c0_i32, %c0_i32_0 : i32, i32
  }
  func.func @transform_2(%arg0: i32) -> (i32, i32, i32, i32) {
    %c0_i32 = arith.constant 0 : i32
    %c0_i32_0 = arith.constant 0 : i32
    %c0_i32_1 = arith.constant 0 : i32
    %c0_i32_2 = arith.constant 0 : i32
    %c0_i32_3 = arith.constant 0 : i32
    return %c0_i32, %c0_i32_0, %c0_i32_1, %c0_i32_2 : i32, i32, i32, i32
  }
  func.func @transform_3(%arg0: i32) -> (i32, i32) {
    %c0_i32 = arith.constant 0 : i32
    %c0_i32_0 = arith.constant 0 : i32
    %c0_i32_1 = arith.constant 0 : i32
    return %c0_i32, %c0_i32_0 : i32, i32
  }
  func.func @transform_4(%arg0: i32) -> (i32, i32, i32, i32) {
    %c0_i32 = arith.constant 0 : i32
    %c0_i32_0 = arith.constant 0 : i32
    %c0_i32_1 = arith.constant 0 : i32
    %c0_i32_2 = arith.constant 0 : i32
    %c0_i32_3 = arith.constant 0 : i32
    return %c0_i32, %c0_i32_0, %c0_i32_1, %c0_i32_2 : i32, i32, i32, i32
  }
  func.func @transform_5(%arg0: i32) -> (i32, i32) {
    %c0_i32 = arith.constant 0 : i32
    %c0_i32_0 = arith.constant 0 : i32
    %c0_i32_1 = arith.constant 0 : i32
    return %c0_i32, %c0_i32_0 : i32, i32
  }
  func.func @transform_6(%arg0: i32) -> (i32, i32, i32) {
    %c0_i32 = arith.constant 0 : i32
    %c0_i32_0 = arith.constant 0 : i32
    %c0_i32_1 = arith.constant 0 : i32
    %c0_i32_2 = arith.constant 0 : i32
    return %c0_i32, %c0_i32_0, %c0_i32_1 : i32, i32, i32
  }
  func.func @transform_7(%arg0: i32) -> (i32, i32) {
    %c0_i32 = arith.constant 0 : i32
    %c0_i32_0 = arith.constant 0 : i32
    %c0_i32_1 = arith.constant 0 : i32
    return %c0_i32, %c0_i32_0 : i32, i32
  }
  func.func @transform_8(%arg0: i32) -> (i32, i32, i32) {
    %c0_i32 = arith.constant 0 : i32
    %c0_i32_0 = arith.constant 0 : i32
    %c0_i32_1 = arith.constant 0 : i32
    %c0_i32_2 = arith.constant 0 : i32
    return %c0_i32, %c0_i32_0, %c0_i32_1 : i32, i32, i32
  }
  func.func @transform_9(%arg0: i32) -> (i32, i32) {
    %c0_i32 = arith.constant 0 : i32
    %c0_i32_0 = arith.constant 0 : i32
    %c0_i32_1 = arith.constant 0 : i32
    return %c0_i32, %c0_i32_0 : i32, i32
  }
  func.func @transform_10(%arg0: i32) -> (i32, i32) {
    %c0_i32 = arith.constant 0 : i32
    %c0_i32_0 = arith.constant 0 : i32
    return %c0_i32, %arg0 : i32, i32
  }
}

</mosaic_0001>

<bundles_post_ra>
// kernel: forward.1
= control target key start
LH: loop header
LB: loop body
LE: loop exit
PB: predicated region body
PF: predicated region fallthrough
CT: control target
= control target key end

     0   :  { %15 = vsyncpa [#allocation3], 0  ;;  %s2023_s0 = inlined_call_operand.vmem [shape: f32[3,256], index: 0, kind: input, shape index: {}]   ;;  %s2024_s1 = inlined_call_operand.hbm [shape: f32[256,512], index: 1, kind: input, shape index: {}]   ;;  %s2025_s2 = inlined_call_operand.vmem [shape: f32[3,3,8,256], index: 2, kind: input, shape index: {}]   ;;  %s2026_s3 = inlined_call_operand.hbm [shape: f32[8,256], index: 3, kind: input, shape index: {}]   ;;  %s2027_s4 = inlined_call_operand.hbm [shape: f32[2,8,4,256], index: 4, kind: input, shape index: {}]   ;;  %s2028_s5 = inlined_call_operand.hbm [shape: f32[4,256], index: 5, kind: input, shape index: {}]   ;;  %s2029_s6 = inlined_call_operand.hbm [shape: f32[4,6,256], index: 6, kind: input, shape index: {}]   ;;  %s2030_s7 = inlined_call_operand.hbm [shape: f32[6,256], index: 7, kind: input, shape index: {}]   ;;  %s2031_s8 = inlined_call_operand.vmem [shape: f32[6,2,256], index: 8, kind: input, shape index: {}]   ;;  %s2032_s9 = inlined_call_operand.vmem [shape: f32[2,256], index: 9, kind: input, shape index: {}]   ;;  %s2033_s10 = inlined_call_operand.vmem [shape: f32[2,256], index: 10, kind: output, shape index: {}]  }
   0x1   :  { %16 = vsyncpa [#allocation5], 0 }
   0x2   :  { %17 = vsyncpa [#allocation8], 0 }
   0x3   :  { %18 = vsyncpa [#allocation11], 0  ;;  %s1563_s13 = smov [#allocation4]   ;;  %s1564_s15 = smov [#allocation7]  }
   0x4   :  { %s41_s14 = sshll.u32 %s1563_s13, 4  ;;  %s63_s16 = sshll.u32 %s1564_s15, 4  ;;  %s42_s14 = int_to_ptr.vmem [resolvable:$true] %s41_s14  ;;  %s64_s16 = int_to_ptr.vmem [resolvable:$true] %s63_s16 }
   0x5   :  { %s1423_s19 = scalar_lea.hbm %s2026_s3, 256 }
   0x6   :  { %p1424_p0 = scmp.ne.s32.totalorder %s2026_s3, %s1423_s19  ;;  %p1427_p1 = scmp.lt.u32.totalorder %s1423_s19, %s2026_s3 }
   0x8   :  { %p1429_p2 = pnand %p1427_p1, %p1424_p0 }
   0xa   :  { %1432 = shalt.err (!%p1429_p2)
}
   0xb   :  { %s1433_s24 = scalar_lea.vmem %s42_s14, 256  ;;  %p1438_p4 = scmp.lt.s32.totalorder %s42_s14, %s42_s14 }
   0xc   :  { %p1434_p3 = scmp.ne.s32.totalorder %s42_s14, %s1433_s24  ;;  %p1439_p5 = scmp.lt.s32.totalorder %s1433_s24, %s1433_s24 }
   0xe   :  { %p1440_p6 = por %p1439_p5, %p1438_p4 }
  0x10   :  { %p1441_p7 = pnand %p1440_p6, %p1434_p3 }
  0x12   :  { %1444 = shalt.err (!%p1441_p7)
}
  0x13   :  { %44 = dma.hbm_to_vmem [thread:$0]  %s2026_s3, 256, %s42_s14, [#allocation5]  }
  0x14   :  { %s1445_s29 = scalar_lea.hbm %s2028_s5, 128 }
  0x15   :  { %p1446_p8 = scmp.ne.s32.totalorder %s2028_s5, %s1445_s29  ;;  %p1449_p9 = scmp.lt.u32.totalorder %s1445_s29, %s2028_s5 }
  0x17   :  { %p1451_p10 = pnand %p1449_p9, %p1446_p8 }
  0x19   :  { %1454 = shalt.err (!%p1451_p10)
}
  0x1a   :  { %s1455_s15 = scalar_lea.vmem %s64_s16, 128  ;;  %p1460_p12 = scmp.lt.s32.totalorder %s64_s16, %s64_s16 }
  0x1b   :  { %p1456_p11 = scmp.ne.s32.totalorder %s64_s16, %s1455_s15  ;;  %p1461_p13 = scmp.lt.s32.totalorder %s1455_s15, %s1455_s15 }
  0x1d   :  { %p1462_p0 = por %p1461_p13, %p1460_p12 }
  0x1f   :  { %p1463_p1 = pnand %p1462_p0, %p1456_p11 }
  0x21   :  { %1466 = shalt.err (!%p1463_p1)
}
  0x22   :  { %66 = dma.hbm_to_vmem [thread:$0]  %s2028_s5, 128, %s64_s16, [#allocation8]  }
  0x23   :  { %s1565_s17 = smov [#allocation2]   ;;  %s1467_s21 = scalar_lea.hbm %s2024_s1, 16384 }
  0x24   :  { %s26_s18 = sshll.u32 %s1565_s17, 4  ;;  %p1468_p2 = scmp.ne.s32.totalorder %s2024_s1, %s1467_s21  ;;  %s27_s18 = int_to_ptr.vmem [resolvable:$true] %s26_s18 }
  0x25   :  { %p1471_p3 = scmp.lt.u32.totalorder %s1467_s21, %s2024_s1 }
  0x27   :  { %p1473_p4 = pnand %p1471_p3, %p1468_p2 }
  0x29   :  { %1476 = shalt.err (!%p1473_p4)
}
  0x2a   :  { %s1477_s26 = scalar_lea.vmem %s27_s18, 16384  ;;  %p1482_p6 = scmp.lt.s32.totalorder %s27_s18, %s27_s18 }
  0x2b   :  { %p1478_p5 = scmp.ne.s32.totalorder %s27_s18, %s1477_s26  ;;  %p1483_p7 = scmp.lt.s32.totalorder %s1477_s26, %s1477_s26 }
  0x2d   :  { %p1484_p8 = por %p1483_p7, %p1482_p6 }
  0x2f   :  { %p1485_p9 = pnand %p1484_p8, %p1478_p5 }
  0x31   :  { %1488 = shalt.err (!%p1485_p9)
}
  0x32   :  { %s1566_s5 = smov 512   ;;  %s1567_s16 = smov 32  }
  0x33   :  { %32 = dma.hbm_to_vmem [thread:$0]  %s2024_s1, 16384, %s27_s18, [#allocation3], %s1566_s5, %s1566_s5, %s1567_s16  }
  0x34   :  { %s1568_s29 = smov [#allocation6]   ;;  %s1489_s13 = scalar_lea.hbm %s2027_s4, 2048 }
  0x35   :  { %s50_s30 = sshll.u32 %s1568_s29, 4  ;;  %p1490_p10 = scmp.ne.s32.totalorder %s2027_s4, %s1489_s13  ;;  %s51_s30 = int_to_ptr.vmem [resolvable:$true] %s50_s30 }
  0x36   :  { %p1493_p11 = scmp.lt.u32.totalorder %s1489_s13, %s2027_s4 }
  0x38   :  { %p1495_p12 = pnand %p1493_p11, %p1490_p10 }
  0x3a   :  { %1498 = shalt.err (!%p1495_p12)
}
  0x3b   :  { %s1499_s19 = scalar_lea.vmem %s51_s30, 2048  ;;  %p1504_p0 = scmp.lt.s32.totalorder %s51_s30, %s51_s30 }
  0x3c   :  { %p1500_p13 = scmp.ne.s32.totalorder %s51_s30, %s1499_s19  ;;  %p1505_p1 = scmp.lt.s32.totalorder %s1499_s19, %s1499_s19 }
  0x3e   :  { %p1506_p2 = por %p1505_p1, %p1504_p0 }
  0x40   :  { %p1507_p3 = pnand %p1506_p2, %p1500_p13 }
  0x42   :  { %1510 = shalt.err (!%p1507_p3)
}
  0x43   :  { %s1569_s1 = smov 128   ;;  %s1570_s18 = smov 8  }
  0x44   :  { %56 = dma.hbm_to_vmem [thread:$0]  %s2027_s4, 2048, %s51_s30, [#allocation5], %s1569_s1, %s1569_s1, %s1570_s18  }
  0x45   :  { %s1571_s22 = smov [#allocation9]   ;;  %s1511_s26 = scalar_lea.hbm %s2029_s6, 1024 }
  0x46   :  { %s72_s23 = sshll.u32 %s1571_s22, 4  ;;  %p1512_p4 = scmp.ne.s32.totalorder %s2029_s6, %s1511_s26  ;;  %s73_s23 = int_to_ptr.vmem [resolvable:$true] %s72_s23 }
  0x47   :  { %p1515_p5 = scmp.lt.u32.totalorder %s1511_s26, %s2029_s6 }
  0x49   :  { %p1517_p6 = pnand %p1515_p5, %p1512_p4 }
  0x4b   :  { %1520 = shalt.err (!%p1517_p6)
}
  0x4c   :  { %s1521_s29 = scalar_lea.vmem %s73_s23, 1024  ;;  %p1526_p8 = scmp.lt.s32.totalorder %s73_s23, %s73_s23 }
  0x4d   :  { %p1522_p7 = scmp.ne.s32.totalorder %s73_s23, %s1521_s29  ;;  %p1527_p9 = scmp.lt.s32.totalorder %s1521_s29, %s1521_s29 }
  0x4f   :  { %p1528_p10 = por %p1527_p9, %p1526_p8 }
  0x51   :  { %p1529_p11 = pnand %p1528_p10, %p1522_p7 }
  0x53   :  { %1532 = shalt.err (!%p1529_p11)
}
  0x54   :  { %s1572_s4 = smov 256   ;;  %s1573_s30 = smov 16  }
  0x55   :  { %78 = dma.hbm_to_vmem [thread:$0]  %s2029_s6, 1024, %s73_s23, [#allocation8], %s1572_s4, %s1572_s4, %s1573_s30  }
  0x56   :  { %s1574_s13 = smov [#allocation10]   ;;  %s1533_s17 = scalar_lea.hbm %s2030_s7, 256 }
  0x57   :  { %s85_s15 = sshll.u32 %s1574_s13, 4  ;;  %p1534_p12 = scmp.ne.s32.totalorder %s2030_s7, %s1533_s17  ;;  %s86_s15 = int_to_ptr.vmem [resolvable:$true] %s85_s15 }
  0x58   :  { %p1537_p13 = scmp.lt.u32.totalorder %s1533_s17, %s2030_s7 }
  0x5a   :  { %p1539_p0 = pnand %p1537_p13, %p1534_p12 }
  0x5c   :  { %1542 = shalt.err (!%p1539_p0)
}
  0x5d   :  { %s1543_s21 = scalar_lea.vmem %s86_s15, 256  ;;  %p1548_p2 = scmp.lt.s32.totalorder %s86_s15, %s86_s15 }
  0x5e   :  { %p1544_p1 = scmp.ne.s32.totalorder %s86_s15, %s1543_s21  ;;  %p1549_p3 = scmp.lt.s32.totalorder %s1543_s21, %s1543_s21 }
  0x60   :  { %p1550_p4 = por %p1549_p3, %p1548_p2 }
  0x62   :  { %p1551_p5 = pnand %p1550_p4, %p1544_p1 }
  0x64   :  { %1554 = shalt.err (!%p1551_p5)
}
  0x65   :  { %88 = dma.hbm_to_vmem [thread:$0]  %s2030_s7, 256, %s86_s15, [#allocation11]  }
  0x66   :  { %1555 = dma.done.wait [#allocation3], 16384  }
  0x67   :  { %1556 = vsyncadd [#allocation3], 4294950912 }
  0x68   :  { %1557 = dma.done.wait [#allocation5], 2304  }
  0x69   :  { %1558 = vsyncadd [#allocation5], 4294964992 }
  0x6a   :  { %1559 = dma.done.wait [#allocation8], 1152  }
  0x6b   :  { %1560 = vsyncadd [#allocation8], 4294966144 }
  0x6c   :  { %1561 = dma.done.wait [#allocation11], 256  }
  0x6d   :  { %1562 = vsyncadd [#allocation11], 4294967040  ;;  %v190_v0 = vld [vmem:[#allocation2 + $0x8] sm:$0xff]  ;;  %v189_v2 = vld [vmem:[#allocation2] sm:$0xff] }
  0x6e   :  { %v194_v1 = vld [vmem:[#allocation2 + $0x28] sm:$0xff]  ;;  %v193_v4 = vld [vmem:[#allocation2 + $0x20] sm:$0xff]  ;;  %v192_v11 = vld [vmem:[#allocation2 + $0x18] sm:$0xff] }
  0x6f   :  { %v1703_v3 = vpack.c.bf16 %v194_v1, %v190_v0  ;;  %v198_v5 = vld [vmem:[#allocation2 + $0x48] sm:$0xff]  ;;  %v1705_v7 = vpack.c.bf16 %v193_v4, %v189_v2  ;;  %v197_v9 = vld [vmem:[#allocation2 + $0x40] sm:$0xff]  ;;  %v196_v12 = vld [vmem:[#allocation2 + $0x38] sm:$0xff] }
  0x70   :  { %v202_v6 = vld [vmem:[#allocation2 + $0x68] sm:$0xff]  ;;  %v201_v10 = vld [vmem:[#allocation2 + $0x60] sm:$0xff]  ;;  %v191_v13 = vld [vmem:[#allocation2 + $0x10] sm:$0xff]  ;;  %v1281_v16 = vpack.c.bf16 %v196_v12, %v192_v11 }
  0x71   :  { %v1707_v8 = vpack.c.bf16 %v202_v6, %v198_v5  ;;  %1218 = vmatprep.subr.bf16.mxu0 %v1703_v3  ;;  %v195_v14 = vld [vmem:[#allocation2 + $0x30] sm:$0xff]  ;;  %v1711_v15 = vpack.c.bf16 %v201_v10, %v197_v9  ;;  %v206_v18 = vld [vmem:[#allocation2 + $0x88] sm:$0xff]  ;;  %v205_v20 = vld [vmem:[#allocation2 + $0x80] sm:$0xff] }
  0x72   :  { %1220 = vmatpush1.bf16.msra.mxu0 %v1705_v7  ;;  %v1283_v17 = vpack.c.bf16 %v195_v14, %v191_v13  ;;  %v210_v19 = vld [vmem:[#allocation2 + $0xa8] sm:$0xff]  ;;  %v209_v22 = vld [vmem:[#allocation2 + $0xa0] sm:$0xff]  ;;  %v200_v23 = vld [vmem:[#allocation2 + $0x58] sm:$0xff]  ;;  %1282 = vmatprep.subr.bf16.mxu1 %v1281_v16 }
  0x73   :  { %1222 = vmatprep.subr.bf16.mxu0 %v1707_v8  ;;  %v1714_v21 = vpack.c.bf16 %v210_v19, %v206_v18  ;;  %v204_v24 = vld [vmem:[#allocation2 + $0x78] sm:$0xff]  ;;  %v199_v26 = vld [vmem:[#allocation2 + $0x50] sm:$0xff]  ;;  %v214_v28 = vld [vmem:[#allocation2 + $0xc8] sm:$0xff]  ;;  %v1717_v31 = vpack.c.bf16 %v209_v22, %v205_v20 }
  0x74   :  { %v1285_v25 = vpack.c.bf16 %v204_v24, %v200_v23  ;;  %v203_v27 = vld [vmem:[#allocation2 + $0x70] sm:$0xff]  ;;  %1284 = vmatpush1.bf16.msra.mxu1 %v1283_v17  ;;  %v218_v30 = vld [vmem:[#allocation2 + $0xe8] sm:$0xff]  ;;  %v208_v32 = vld [vmem:[#allocation2 + $0x98] sm:$0xff] }
  0x75   :  { %v1287_v29 = vpack.c.bf16 %v203_v27, %v199_v26  ;;  %v212_v33 = vld [vmem:[#allocation2 + $0xb8] sm:$0xff]  ;;  %v207_v34 = vld [vmem:[#allocation2 + $0x90] sm:$0xff]  ;;  %v1720_v35 = vpack.c.bf16 %v218_v30, %v214_v28  ;;  %v213_v36 = vld [vmem:[#allocation2 + $0xc0] sm:$0xff] }
  0x76   :  { %1224 = vmatpush1.bf16.msra.mxu0 %v1711_v15  ;;  %1286 = vmatprep.subr.bf16.mxu1 %v1285_v25  ;;  %v217_v37 = vld [vmem:[#allocation2 + $0xe0] sm:$0xff]  ;;  %v1289_v38 = vpack.c.bf16 %v212_v33, %v208_v32  ;;  %v211_v39 = vld [vmem:[#allocation2 + $0xb0] sm:$0xff]  ;;  %v222_v40 = vld [vmem:[#allocation2 + $0x108] sm:$0xff] }
  0x77   :  { %1226 = vmatprep.subr.bf16.mxu0 %v1714_v21  ;;  %v226_v41 = vld [vmem:[#allocation2 + $0x128] sm:$0xff]  ;;  %v216_v42 = vld [vmem:[#allocation2 + $0xd8] sm:$0xff]  ;;  %v1291_v43 = vpack.c.bf16 %v211_v39, %v207_v34  ;;  %v1723_v45 = vpack.c.bf16 %v217_v37, %v213_v36  ;;  %v221_v46 = vld [vmem:[#allocation2 + $0x100] sm:$0xff] }
  0x78   :  { %1288 = vmatpush1.bf16.msra.mxu1 %v1287_v29  ;;  %v220_v44 = vld [vmem:[#allocation2 + $0xf8] sm:$0xff]  ;;  %v215_v48 = vld [vmem:[#allocation2 + $0xd0] sm:$0xff]  ;;  %v1726_v50 = vpack.c.bf16 %v226_v41, %v222_v40  ;;  %v225_v51 = vld [vmem:[#allocation2 + $0x120] sm:$0xff] }
  0x79   :  { %1290 = vmatprep.subr.bf16.mxu1 %v1289_v38  ;;  %v1293_v47 = vpack.c.bf16 %v220_v44, %v216_v42  ;;  %v219_v49 = vld [vmem:[#allocation2 + $0xf0] sm:$0xff]  ;;  %v224_v52 = vld [vmem:[#allocation2 + $0x118] sm:$0xff]  ;;  %v230_v54 = vld [vmem:[#allocation2 + $0x148] sm:$0xff]  ;;  %v1729_v57 = vpack.c.bf16 %v225_v51, %v221_v46 }
  0x7a   :  { %1228 = vmatpush1.bf16.msra.mxu0 %v1717_v31  ;;  %v228_v53 = vld [vmem:[#allocation2 + $0x138] sm:$0xff]  ;;  %v234_v55 = vld [vmem:[#allocation2 + $0x168] sm:$0xff]  ;;  %v1295_v56 = vpack.c.bf16 %v219_v49, %v215_v48  ;;  %v229_v58 = vld [vmem:[#allocation2 + $0x140] sm:$0xff] }
  0x7b   :  { %1230 = vmatprep.subr.bf16.mxu0 %v1720_v35  ;;  %v1297_v59 = vpack.c.bf16 %v228_v53, %v224_v52  ;;  %v223_v60 = vld [vmem:[#allocation2 + $0x110] sm:$0xff]  ;;  %v1732_v62 = vpack.c.bf16 %v234_v55, %v230_v54  ;;  %v233_v63 = vld [vmem:[#allocation2 + $0x160] sm:$0xff]  ;;  %v232_v0 = vld [vmem:[#allocation2 + $0x158] sm:$0xff] }
  0x7c   :  { %1292 = vmatpush1.bf16.msra.mxu1 %v1291_v43  ;;  %v227_v61 = vld [vmem:[#allocation2 + $0x130] sm:$0xff]  ;;  %v236_v1 = vld [vmem:[#allocation2 + $0x178] sm:$0xff]  ;;  %v238_v2 = vld [vmem:[#allocation2 + $0x188] sm:$0xff]  ;;  %v1735_v6 = vpack.c.bf16 %v233_v63, %v229_v58 }
  0x7d   :  { %1294 = vmatprep.subr.bf16.mxu1 %v1293_v47  ;;  %v242_v4 = vld [vmem:[#allocation2 + $0x1a8] sm:$0xff]  ;;  %v1299_v5 = vpack.c.bf16 %v227_v61, %v223_v60  ;;  %v237_v9 = vld [vmem:[#allocation2 + $0x180] sm:$0xff]  ;;  %v1301_v10 = vpack.c.bf16 %v236_v1, %v232_v0  ;;  %v231_v11 = vld [vmem:[#allocation2 + $0x150] sm:$0xff] }
  0x7e   :  { %1232 = vmatpush1.bf16.msra.mxu0 %v1723_v45  ;;  %v235_v12 = vld [vmem:[#allocation2 + $0x170] sm:$0xff]  ;;  %v1738_v13 = vpack.c.bf16 %v242_v4, %v238_v2  ;;  %v241_v14 = vld [vmem:[#allocation2 + $0x1a0] sm:$0xff]  ;;  %v240_v16 = vld [vmem:[#allocation2 + $0x198] sm:$0xff] }
  0x7f   :  { %1234 = vmatprep.subr.bf16.mxu0 %v1726_v50  ;;  %v244_v17 = vld [vmem:[#allocation2 + $0x1b8] sm:$0xff]  ;;  %v246_v18 = vld [vmem:[#allocation2 + $0x1c8] sm:$0xff]  ;;  %v1303_v20 = vpack.c.bf16 %v235_v12, %v231_v11  ;;  %v1741_v22 = vpack.c.bf16 %v241_v14, %v237_v9  ;;  %v245_v23 = vld [vmem:[#allocation2 + $0x1c0] sm:$0xff] }
  0x80   :  { %1296 = vmatpush1.bf16.msra.mxu1 %v1295_v56  ;;  %v250_v19 = vld [vmem:[#allocation2 + $0x1e8] sm:$0xff]  ;;  %v1305_v24 = vpack.c.bf16 %v244_v17, %v240_v16  ;;  %v239_v25 = vld [vmem:[#allocation2 + $0x190] sm:$0xff]  ;;  %v249_v28 = vld [vmem:[#allocation2 + $0x1e0] sm:$0xff] }
  0x81   :  { %1298 = vmatprep.subr.bf16.mxu1 %v1297_v59  ;;  %v243_v26 = vld [vmem:[#allocation2 + $0x1b0] sm:$0xff]  ;;  %v1744_v27 = vpack.c.bf16 %v250_v19, %v246_v18  ;;  %v248_v29 = vld [vmem:[#allocation2 + $0x1d8] sm:$0xff]  ;;  %v254_v32 = vld [vmem:[#allocation2 + $0x208] sm:$0xff]  ;;  %v1747_v36 = vpack.c.bf16 %v249_v28, %v245_v23 }
  0x82   :  { %1236 = vmatpush1.bf16.msra.mxu0 %v1729_v57  ;;  %v252_v30 = vld [vmem:[#allocation2 + $0x1f8] sm:$0xff]  ;;  %v258_v33 = vld [vmem:[#allocation2 + $0x228] sm:$0xff]  ;;  %v1307_v34 = vpack.c.bf16 %v243_v26, %v239_v25  ;;  %v253_v37 = vld [vmem:[#allocation2 + $0x200] sm:$0xff] }
  0x83   :  { %1238 = vmatprep.subr.bf16.mxu0 %v1732_v62  ;;  %v1309_v38 = vpack.c.bf16 %v252_v30, %v248_v29  ;;  %v247_v39 = vld [vmem:[#allocation2 + $0x1d0] sm:$0xff]  ;;  %v1750_v41 = vpack.c.bf16 %v258_v33, %v254_v32  ;;  %v257_v42 = vld [vmem:[#allocation2 + $0x220] sm:$0xff]  ;;  %v256_v43 = vld [vmem:[#allocation2 + $0x218] sm:$0xff] }
  0x84   :  { %1300 = vmatpush1.bf16.msra.mxu1 %v1299_v5  ;;  %v251_v40 = vld [vmem:[#allocation2 + $0x1f0] sm:$0xff]  ;;  %v260_v44 = vld [vmem:[#allocation2 + $0x238] sm:$0xff]  ;;  %v262_v46 = vld [vmem:[#allocation2 + $0x248] sm:$0xff]  ;;  %v1753_v49 = vpack.c.bf16 %v257_v42, %v253_v37 }
  0x85   :  { %1302 = vmatprep.subr.bf16.mxu1 %v1301_v10  ;;  %v266_v47 = vld [vmem:[#allocation2 + $0x268] sm:$0xff]  ;;  %v1311_v48 = vpack.c.bf16 %v251_v40, %v247_v39  ;;  %v261_v51 = vld [vmem:[#allocation2 + $0x240] sm:$0xff]  ;;  %v1313_v52 = vpack.c.bf16 %v260_v44, %v256_v43  ;;  %v255_v53 = vld [vmem:[#allocation2 + $0x210] sm:$0xff] }
  0x86   :  { %1240 = vmatpush1.bf16.msra.mxu0 %v1735_v6  ;;  %v259_v54 = vld [vmem:[#allocation2 + $0x230] sm:$0xff]  ;;  %v1756_v55 = vpack.c.bf16 %v266_v47, %v262_v46  ;;  %v265_v56 = vld [vmem:[#allocation2 + $0x260] sm:$0xff]  ;;  %v264_v58 = vld [vmem:[#allocation2 + $0x258] sm:$0xff] }
  0x87   :  { %1242 = vmatprep.subr.bf16.mxu0 %v1738_v13  ;;  %v268_v59 = vld [vmem:[#allocation2 + $0x278] sm:$0xff]  ;;  %v270_v60 = vld [vmem:[#allocation2 + $0x288] sm:$0xff]  ;;  %v1315_v63 = vpack.c.bf16 %v259_v54, %v255_v53  ;;  %v1759_v0 = vpack.c.bf16 %v265_v56, %v261_v51  ;;  %v269_v1 = vld [vmem:[#allocation2 + $0x280] sm:$0xff] }
  0x88   :  { %1304 = vmatpush1.bf16.msra.mxu1 %v1303_v20  ;;  %v274_v61 = vld [vmem:[#allocation2 + $0x2a8] sm:$0xff]  ;;  %v1317_v2 = vpack.c.bf16 %v268_v59, %v264_v58  ;;  %v263_v4 = vld [vmem:[#allocation2 + $0x250] sm:$0xff]  ;;  %v273_v10 = vld [vmem:[#allocation2 + $0x2a0] sm:$0xff] }
  0x89   :  { %1306 = vmatprep.subr.bf16.mxu1 %v1305_v24  ;;  %v267_v5 = vld [vmem:[#allocation2 + $0x270] sm:$0xff]  ;;  %v1762_v9 = vpack.c.bf16 %v274_v61, %v270_v60  ;;  %v272_v11 = vld [vmem:[#allocation2 + $0x298] sm:$0xff]  ;;  %v278_v14 = vld [vmem:[#allocation2 + $0x2c8] sm:$0xff]  ;;  %v1765_v19 = vpack.c.bf16 %v273_v10, %v269_v1 }
  0x8a   :  { %1244 = vmatpush1.bf16.msra.mxu0 %v1741_v22  ;;  %v276_v12 = vld [vmem:[#allocation2 + $0x2b8] sm:$0xff]  ;;  %v282_v16 = vld [vmem:[#allocation2 + $0x2e8] sm:$0xff]  ;;  %v1319_v17 = vpack.c.bf16 %v267_v5, %v263_v4  ;;  %v277_v18 = vld [vmem:[#allocation2 + $0x2c0] sm:$0xff] }
  0x8b   :  { %1246 = vmatprep.subr.bf16.mxu0 %v1744_v27  ;;  %v281_v20 = vld [vmem:[#allocation2 + $0x2e0] sm:$0xff]  ;;  %v1321_v23 = vpack.c.bf16 %v276_v12, %v272_v11  ;;  %v271_v24 = vld [vmem:[#allocation2 + $0x290] sm:$0xff]  ;;  %v1768_v26 = vpack.c.bf16 %v282_v16, %v278_v14  ;;  %v280_v28 = vld [vmem:[#allocation2 + $0x2d8] sm:$0xff] }
  0x8c   :  { %1308 = vmatpush1.bf16.msra.mxu1 %v1307_v34  ;;  %v275_v25 = vld [vmem:[#allocation2 + $0x2b0] sm:$0xff]  ;;  %v284_v29 = vld [vmem:[#allocation2 + $0x2f8] sm:$0xff]  ;;  %v286_v32 = vld [vmem:[#allocation2 + $0x308] sm:$0xff] }
  0x8d   :  { %1310 = vmatprep.subr.bf16.mxu1 %v1309_v38  ;;  %v1773_v30 = vld [vmem:[%s2023_s0] sm:$0x77]  ;;  %v290_v33 = vld [vmem:[#allocation2 + $0x328] sm:$0xff]  ;;  %v1323_v37 = vpack.c.bf16 %v275_v25, %v271_v24  ;;  %v1778_v38 = vpack.c.bf16 %v281_v20, %v277_v18  ;;  %v285_v39 = vld [vmem:[#allocation2 + $0x300] sm:$0xff]  ;;  %v1325_v40 = vpack.c.bf16 %v284_v29, %v280_v28 }
  0x8e   :  { %1248 = vmatpush1.bf16.msra.mxu0 %v1747_v36  ;;  %v317_v34 = vcombine.high %v1773_v30, %v1773_v30  ;;  %v279_v42 = vld [vmem:[#allocation2 + $0x2d0] sm:$0xff]  ;;  %v1781_v44 = vpack.c.bf16 %v290_v33, %v286_v32  ;;  %v289_v46 = vld [vmem:[#allocation2 + $0x320] sm:$0xff]  ;;  %v288_v47 = vld [vmem:[#allocation2 + $0x318] sm:$0xff] }
  0x8f   :  { %1250 = vmatprep.subr.bf16.mxu0 %v1750_v41  ;;  %v283_v43 = vld [vmem:[#allocation2 + $0x2f0] sm:$0xff]  ;;  %v294_v51 = vld [vmem:[#allocation2 + $0x348] sm:$0xff]  ;;  %v1784_v54 = vpack.c.bf16 %v289_v46, %v285_v39  ;;  %v293_v56 = vld [vmem:[#allocation2 + $0x340] sm:$0xff] }
  0x90   :  { %1312 = vmatpush1.bf16.msra.mxu1 %v1311_v48  ;;  %v292_v48 = vld [vmem:[#allocation2 + $0x338] sm:$0xff]  ;;  %383 = vmatprep.mubr.f32.mxu0 %v317_v34  ;;  %v1327_v53 = vpack.c.bf16 %v283_v43, %v279_v42  ;;  %v287_v59 = vld [vmem:[#allocation2 + $0x310] sm:$0xff]  ;;  %v302_v4 = vld [vmem:[#allocation2 + $0x388] sm:$0xff] }
  0x91   :  { %1314 = vmatprep.subr.bf16.mxu1 %v1313_v52  ;;  %v298_v52 = vld [vmem:[#allocation2 + $0x368] sm:$0xff]  ;;  %454 = vmatprep.mubr.f32.mxu1 %v317_v34  ;;  %v1329_v58 = vpack.c.bf16 %v292_v48, %v288_v47  ;;  %v291_v60 = vld [vmem:[#allocation2 + $0x330] sm:$0xff]  ;;  %v296_v1 = vld [vmem:[#allocation2 + $0x358] sm:$0xff] }
  0x92   :  { %1252 = vmatpush1.bf16.msra.mxu0 %v1753_v49  ;;  %v1787_v61 = vpack.c.bf16 %v298_v52, %v294_v51  ;;  %v306_v5 = vld [vmem:[#allocation2 + $0x3a8] sm:$0xff]  ;;  %v1331_v10 = vpack.c.bf16 %v291_v60, %v287_v59  ;;  %v301_v12 = vld [vmem:[#allocation2 + $0x380] sm:$0xff]  ;;  %v295_v16 = vld [vmem:[#allocation2 + $0x350] sm:$0xff] }
  0x93   :  { %1254 = vmatprep.subr.bf16.mxu0 %v1756_v55  ;;  %v1793_v18 = vpack.c.bf16 %v306_v5, %v302_v4  ;;  %v305_v20 = vld [vmem:[#allocation2 + $0x3a0] sm:$0xff]  ;;  %v308_v24 = vld [vmem:[#allocation2 + $0x3b8] sm:$0xff]  ;;  %v310_v25 = vld [vmem:[#allocation2 + $0x3c8] sm:$0xff] }
  0x94   :  { %1316 = vmatpush1.bf16.msra.mxu1 %v1315_v63  ;;  %v297_v63 = vld [vmem:[#allocation2 + $0x360] sm:$0xff]  ;;  %v314_v28 = vld [vmem:[#allocation2 + $0x3e8] sm:$0xff]  ;;  %v1275_v32 = vpack.c.bf16 %v305_v20, %v301_v12  ;;  %v307_v39 = vld [vmem:[#allocation2 + $0x3b0] sm:$0xff] }
  0x95   :  { %1318 = vmatprep.subr.bf16.mxu1 %v1317_v2  ;;  %v300_v2 = vld [vmem:[#allocation2 + $0x378] sm:$0xff]  ;;  %v1790_v11 = vpack.c.bf16 %v297_v63, %v293_v56  ;;  %v309_v33 = vld [vmem:[#allocation2 + $0x3c0] sm:$0xff]  ;;  %v311_v52 = vld [vmem:[#allocation2 + $0x3d0] sm:$0xff] }
  0x96   :  { %1256 = vmatpush1.bf16.msra.mxu0 %v1759_v0  ;;  %v1333_v14 = vpack.c.bf16 %v300_v2, %v296_v1  ;;  %v313_v42 = vld [vmem:[#allocation2 + $0x3e0] sm:$0xff]  ;;  %v312_v43 = vld [vmem:[#allocation2 + $0x3d8] sm:$0xff] }
  0x97   :  { %1258 = vmatprep.subr.bf16.mxu0 %v1762_v9  ;;  %v316_v46 = vld [vmem:[#allocation2 + $0x3f8] sm:$0xff]  ;;  %v1279_v48 = vpack.c.bf16 %v313_v42, %v309_v33 }
  0x98   :  { %1320 = vmatpush1.bf16.msra.mxu1 %v1319_v17  ;;  %v299_v17 = vld [vmem:[#allocation2 + $0x370] sm:$0xff]  ;;  %v1341_v51 = vpack.c.bf16 %v316_v46, %v312_v43 }
  0x99   :  { %1322 = vmatprep.subr.bf16.mxu1 %v1321_v23  ;;  %v304_v23 = vld [vmem:[#allocation2 + $0x398] sm:$0xff]  ;;  %v1335_v29 = vpack.c.bf16 %v299_v17, %v295_v16  ;;  %v1206_v43 = vld [vmem:[%s2025_s2 + $0x60] sm:$0xff] }
  0x9a   :  { %1260 = vmatpush1.bf16.msra.mxu0 %v1765_v19  ;;  %v1337_v34 = vpack.c.bf16 %v308_v24, %v304_v23  ;;  %v1201_v23 = vld [vmem:[%s2025_s2 + $0x38] sm:$0xff]  ;;  %v1202_v24 = vld [vmem:[%s2025_s2 + $0x40] sm:$0xff] }
  0x9b   :  { %1262 = vmatprep.subr.bf16.mxu0 %v1768_v26 }
  0x9c   :  { %1324 = vmatpush1.bf16.msra.mxu1 %v1323_v37  ;;  %v303_v37 = vld [vmem:[#allocation2 + $0x390] sm:$0xff] }
  0x9d   :  { %1326 = vmatprep.subr.bf16.mxu1 %v1325_v40  ;;  %v1277_v40 = vpack.c.bf16 %v314_v28, %v310_v25  ;;  %v1339_v47 = vpack.c.bf16 %v307_v39, %v303_v37  ;;  %v1204_v39 = vld [vmem:[%s2025_s2 + $0x50] sm:$0xff] }
  0x9e   :  { %1264 = vmatpush1.bf16.msra.mxu0 %v1778_v38 }
  0x9f   :  { %1266 = vmatprep.subr.bf16.mxu0 %v1781_v44 }
  0xa0   :  { %1328 = vmatpush1.bf16.msra.mxu1 %v1327_v53  ;;  %v315_v53 = vld [vmem:[#allocation2 + $0x3f0] sm:$0xff] }
  0xa1   :  { %1330 = vmatprep.subr.bf16.mxu1 %v1329_v58  ;;  %v1343_v56 = vpack.c.bf16 %v315_v53, %v311_v52  ;;  %v1205_v52 = vld [vmem:[%s2025_s2 + $0x58] sm:$0xff]  ;;  %v1207_v53 = vld [vmem:[%s2025_s2 + $0x68] sm:$0xff] }
  0xa2   :  { %1268 = vmatpush1.bf16.msra.mxu0 %v1784_v54 }
  0xa3   :  { %1270 = vmatprep.subr.bf16.mxu0 %v1787_v61 }
  0xa4   :  { %1332 = vmatpush1.bf16.msra.mxu1 %v1331_v10 }
  0xa5   :  { %1334 = vmatprep.subr.bf16.mxu1 %v1333_v14  ;;  %v1200_v14 = vld [vmem:[%s2025_s2 + $0x30] sm:$0xff] }
  0xa6   :  { %1272 = vmatpush1.bf16.msra.mxu0 %v1790_v11 }
  0xa7   :  { %1274 = vmatprep.subr.bf16.mxu0 %v1793_v18 }
  0xa8   :  { %1336 = vmatpush1.bf16.msra.mxu1 %v1335_v29 }
  0xa9   :  { %1338 = vmatprep.subr.bf16.mxu1 %v1337_v34  ;;  %v1203_v34 = vld [vmem:[%s2025_s2 + $0x48] sm:$0xff] }
  0xaa   :  { %1276 = vmatpush1.bf16.msra.mxu0 %v1275_v32 }
  0xab   :  { %1278 = vmatprep.subr.bf16.mxu0 %v1277_v40 }
  0xac   :  { %1340 = vmatpush1.bf16.msra.mxu1 %v1339_v47 }
  0xad   :  { %1342 = vmatprep.subr.bf16.mxu1 %v1341_v51 }
  0xae   :  { %1280 = vmatpush1.bf16.msra.mxu0 %v1279_v48 }
  0xaf   :  { %1346 = vmatprep.subr.bf16.mxu0 %v1703_v3  ;;  %v117_v3 = vlaneseq }
  0xb0   :  { %1344 = vmatpush1.bf16.msra.mxu1 %v1343_v56 }
  0xb1   :  { %384 = vmatmul.mubr.f32.vlgmr.msra.gmra.mrb[0].mxu0 %v1773_v30 }
  0xb2   :  { %1348 = vmatpush1.bf16.msra.mxu0 %v1705_v7  ;;  %v1828_v7 = vshrl.u32 %v117_v3, 7 }
  0xb3   :  { %1350 = vmatprep.subr.bf16.mxu0 %v1707_v8  ;;  %455 = vmatmul.mubr.f32.vlgmr.msra.gmra.mrb[0].mxu1 %v1773_v30 }
  0xb4   :  { %v1831_v8 = vsub.s32 0, %v1828_v7 }
  0xb6   :  { %1352 = vmatpush1.bf16.msra.mxu0 %v1711_v15  ;;  %v1834_v15 = vsub.s32 4, %v1828_v7 }
  0xb7   :  { %1354 = vmatprep.subr.bf16.mxu0 %v1714_v21  ;;  %v120_v21 = vrot.slane %v1773_v30, %v1831_v8 }
  0xba   :  { %1356 = vmatpush1.bf16.msra.mxu0 %v1717_v31  ;;  %v1839_v31 = vsub.s32 1, %v1828_v7 }
  0xbb   :  { %1358 = vmatprep.subr.bf16.mxu0 %v1720_v35  ;;  %v124_v35 = vrot.slane %v1773_v30, %v1834_v15 }
  0xbe   :  { %1360 = vmatpush1.bf16.msra.mxu0 %v1723_v45  ;;  %v1844_v45 = vsub.s32 5, %v1828_v7 }
  0xbf   :  { %1362 = vmatprep.subr.bf16.mxu0 %v1726_v50  ;;  %v130_v50 = vrot.slane %v120_v21, %v1831_v8 }
  0xc2   :  { %1364 = vmatpush1.bf16.msra.mxu0 %v1729_v57  ;;  %v145_v57 = vrot.slane %v1773_v30, %v1839_v31 }
  0xc3   :  { %1366 = vmatprep.subr.bf16.mxu0 %v1732_v62  ;;  %v1850_v62 = vsub.s32 2, %v1828_v7 }
  0xc6   :  { %1368 = vmatpush1.bf16.msra.mxu0 %v1735_v6  ;;  %v114_v6 = vld [vmem:[%s2025_s2] sm:$0xff] }
  0xc7   :  { %1370 = vmatprep.subr.bf16.mxu0 %v1738_v13  ;;  %v134_v13 = vrot.slane %v124_v35, %v1831_v8 }
  0xca   :  { %1372 = vmatpush1.bf16.msra.mxu0 %v1741_v22  ;;  %v149_v22 = vrot.slane %v1773_v30, %v1844_v45 }
  0xcb   :  { %1374 = vmatprep.subr.bf16.mxu0 %v1744_v27  ;;  %v1859_v27 = vsub.s32 6, %v1828_v7 }
  0xce   :  { %1376 = vmatpush1.bf16.msra.mxu0 %v1747_v36  ;;  %v115_v36 = vld [vmem:[%s2025_s2 + $0x8] sm:$0xff] }
  0xcf   :  { %1378 = vmatprep.subr.bf16.mxu0 %v1750_v41  ;;  %v135_v41 = vmul.f32 %v130_v50, %v114_v6 }
  0xd2   :  { %1380 = vmatpush1.bf16.msra.mxu0 %v1753_v49  ;;  %v155_v49 = vrot.slane %v145_v57, %v1839_v31 }
  0xd3   :  { %1382 = vmatprep.subr.bf16.mxu0 %v1756_v55  ;;  %v170_v55 = vrot.slane %v1773_v30, %v1850_v62 }
  0xd5   :  { %v180_v60 = vrot.slane %v170_v55, %v1850_v62 }
  0xd6   :  { %1384 = vmatpush1.bf16.msra.mxu0 %v1759_v0  ;;  %v112_v0 = vld [vmem:[#allocation4] sm:$0xff] }
  0xd7   :  { %1386 = vmatprep.subr.bf16.mxu0 %v1762_v9  ;;  %v1196_v9 = vld [vmem:[%s2025_s2 + $0x10] sm:$0xff]  ;;  %v137_v58 = vadd.f32 %v135_v41, %v112_v0 }
  0xd8   :  { %v160_v59 = vmul.f32 %v1196_v9, %v155_v49  ;;  %v1209_v9 = vld [vmem:[%s2025_s2 + $0x78] sm:$0xff] }
  0xda   :  { %1388 = vmatpush1.bf16.msra.mxu0 %v1765_v19  ;;  %v136_v19 = vmul.f32 %v134_v13, %v115_v36  ;;  %v162_v4 = vadd.f32 %v160_v59, %v137_v58  ;;  %v1208_v36 = vld [vmem:[%s2025_s2 + $0x70] sm:$0xff]  ;;  %v1211_v58 = vld [vmem:[%s2025_s2 + $0x88] sm:$0xff] }
  0xdb   :  { %1390 = vmatprep.subr.bf16.mxu0 %v1768_v26  ;;  %v159_v26 = vrot.slane %v149_v22, %v1839_v31 }
  0xde   :  { %1392 = vmatpush1.bf16.msra.mxu0 %v1778_v38  ;;  %v174_v38 = vrot.slane %v1773_v30, %v1859_v27  ;;  %v1199_v30 = vld [vmem:[%s2025_s2 + $0x28] sm:$0xff] }
  0xdf   :  { %1394 = vmatprep.subr.bf16.mxu0 %v1781_v44  ;;  %v113_v44 = vld [vmem:[#allocation4 + $0x8] sm:$0xff] }
  0xe0   :  { %v138_v63 = vadd.f32 %v136_v19, %v113_v44  ;;  %v184_v2 = vrot.slane %v174_v38, %v1850_v62 }
  0xe2   :  { %1396 = vmatpush1.bf16.msra.mxu0 %v1784_v54  ;;  %v1197_v54 = vld [vmem:[%s2025_s2 + $0x18] sm:$0xff] }
  0xe3   :  { %1398 = vmatprep.subr.bf16.mxu0 %v1787_v61  ;;  %v1198_v61 = vld [vmem:[%s2025_s2 + $0x20] sm:$0xff]  ;;  %v161_v1 = vmul.f32 %v1197_v54, %v159_v26 }
  0xe4   :  { %v185_v5 = vmul.f32 %v1198_v61, %v180_v60  ;;  %v1210_v26 = vld [vmem:[%s2025_s2 + $0x80] sm:$0xff] }
  0xe5   :  { %v163_v10 = vadd.f32 %v161_v1, %v138_v63 }
  0xe6   :  { %1400 = vmatpush1.bf16.msra.mxu0 %v1790_v11  ;;  %v186_v11 = vmul.f32 %v1199_v30, %v184_v2  ;;  %v187_v16 = vadd.f32 %v185_v5, %v162_v4  ;;  %v1933_v4 = vsub.s32 3, %v1828_v7 }
  0xe7   :  { %1402 = vmatprep.subr.bf16.mxu0 %v1793_v18 }
  0xe8   :  { %v188_v25 = vadd.f32 %v186_v11, %v163_v10 }
  0xea   :  { %1404 = vmatpush1.bf16.msra.mxu0 %v1275_v32 }
  0xeb   :  { %1406 = vmatprep.subr.bf16.mxu0 %v1277_v40 }
  0xee   :  { %1408 = vmatpush1.bf16.msra.mxu0 %v1279_v48 }
 0x184   :  { %v385_v12 = vpop.f32.mrb[0].mxu0 }
 0x185   :  { %v467_v17 = vrot.slane %v385_v12, %v1831_v8  ;;  %v482_v18 = vrot.slane %v385_v12, %v1839_v31  ;;  %v387_v20 = vpop.f32.mrb[1].mxu0  ;;  %v497_v33 = vrot.slane %v385_v12, %v1850_v62  ;;  %v1936_v12 = vsub.s32 7, %v1828_v7 }
 0x186   :  { %v471_v28 = vrot.slane %v387_v20, %v1831_v8  ;;  %v486_v29 = vrot.slane %v387_v20, %v1839_v31  ;;  %v456_v37 = vpop.f32.mrb[0].mxu1  ;;  %v501_v42 = vrot.slane %v387_v20, %v1850_v62 }
 0x187   :  { %v472_v32 = vmul.f32 %v1200_v14, %v467_v17  ;;  %v512_v46 = vrot.slane %v456_v37, %v1831_v8  ;;  %v458_v47 = vpop.f32.mrb[1].mxu1  ;;  %v487_v51 = vmul.f32 %v1202_v24, %v482_v18  ;;  %v502_v50 = vmul.f32 %v1204_v39, %v497_v33 }
 0x188   :  { %v473_v40 = vmul.f32 %v1201_v23, %v471_v28  ;;  %v516_v56 = vrot.slane %v458_v47, %v1831_v8  ;;  %v488_v21 = vmul.f32 %v1203_v34, %v486_v29  ;;  %v527_v6 = vrot.slane %v456_v37, %v1839_v31  ;;  %v554_v28 = vld [vmem:[#allocation6] sm:$0xff] }
 0x189   :  { %v474_v48 = vadd.f32 %v472_v32, %v187_v16  ;;  %v517_v57 = vmul.f32 %v1206_v43, %v512_v46  ;;  %v503_v22 = vmul.f32 %v1205_v52, %v501_v42  ;;  %v531_v49 = vrot.slane %v458_v47, %v1839_v31  ;;  %v553_v43 = vld [vmem:[#allocation7] sm:$0xff]  ;;  %v570_v46 = vld [vmem:[#allocation6 + $0x8] sm:$0xff] }
 0x18a   :  { %v475_v3 = vadd.f32 %v473_v40, %v188_v25  ;;  %v518_v41 = vmul.f32 %v1207_v53, %v516_v56  ;;  %v542_v0 = vrot.slane %v456_v37, %v1850_v62  ;;  %v546_v38 = vrot.slane %v458_v47, %v1850_v62  ;;  %v586_v56 = vld [vmem:[#allocation6 + $0x10] sm:$0xff] }
 0x18b   :  { %v489_v35 = vadd.f32 %v487_v51, %v474_v48  ;;  %v532_v54 = vmul.f32 %v1208_v36, %v527_v6  ;;  %v533_v60 = vmul.f32 %v1209_v9, %v531_v49  ;;  %v602_v6 = vld [vmem:[#allocation6 + $0x18] sm:$0xff] }
 0x18c   :  { %v490_v13 = vadd.f32 %v488_v21, %v475_v3  ;;  %v547_v63 = vmul.f32 %v1210_v26, %v542_v0  ;;  %v548_v2 = vmul.f32 %v1211_v58, %v546_v38  ;;  %v634_v0 = vld [vmem:[#allocation6 + $0x28] sm:$0xff]  ;;  %v650_v26 = vld [vmem:[#allocation6 + $0x30] sm:$0xff] }
 0x18d   :  { %v504_v55 = vadd.f32 %v502_v50, %v489_v35 }
 0x18e   :  { %v505_v19 = vadd.f32 %v503_v22, %v490_v13 }
 0x18f   :  { %v519_v44 = vadd.f32 %v517_v57, %v504_v55 }
 0x190   :  { %v520_v59 = vadd.f32 %v518_v41, %v505_v19  ;;  %v618_v41 = vld [vmem:[#allocation6 + $0x20] sm:$0xff] }
 0x191   :  { %v534_v61 = vadd.f32 %v532_v54, %v519_v44  ;;  %v666_v54 = vld [vmem:[#allocation6 + $0x38] sm:$0xff] }
 0x192   :  { %v535_v1 = vadd.f32 %v533_v60, %v520_v59 }
 0x193   :  { %v549_v30 = vadd.f32 %v547_v63, %v534_v61 }
 0x194   :  { %v550_v5 = vadd.f32 %v548_v2, %v535_v1 }
 0x195   :  { %v551_v10 = vmax.f32 %v549_v30, 0.0 }
 0x196   :  { %v552_v11 = vmax.f32 %v550_v5, 0.0 }
 0x197   :  { %v558_v14 = vrot.slane %v551_v10, %v1831_v8  ;;  %v574_v16 = vrot.slane %v551_v10, %v1839_v31  ;;  %v590_v17 = vrot.slane %v551_v10, %v1850_v62  ;;  %v606_v18 = vrot.slane %v551_v10, %v1933_v4 }
 0x198   :  { %809 = vmatprep.mubr.f32.mxu0 %v552_v11  ;;  %v562_v20 = vrot.slane %v552_v11, %v1831_v8  ;;  %v578_v23 = vrot.slane %v552_v11, %v1839_v31  ;;  %v594_v24 = vrot.slane %v552_v11, %v1850_v62  ;;  %v610_v25 = vrot.slane %v552_v11, %v1933_v4 }
 0x199   :  { %810 = vmatmul.mubr.f32.vlgmr.msra.gmra.mrb[2].mxu0 %v551_v10  ;;  %v622_v29 = vrot.slane %v551_v10, %v1834_v15  ;;  %v626_v32 = vrot.slane %v552_v11, %v1834_v15  ;;  %v638_v33 = vrot.slane %v551_v10, %v1844_v45  ;;  %v642_v34 = vrot.slane %v552_v11, %v1844_v45 }
 0x19a   :  { %v565_v37 = vcombine.low %v558_v14, %v562_v20  ;;  %v581_v39 = vcombine.low %v574_v16, %v578_v23  ;;  %v597_v40 = vcombine.low %v590_v17, %v594_v24  ;;  %v613_v42 = vcombine.low %v606_v18, %v610_v25  ;;  %v817_v20 = vld [vmem:[#allocation6 + $0x40] sm:$0xff] }
 0x19b   :  { %v629_v47 = vcombine.low %v622_v29, %v626_v32  ;;  %v645_v48 = vcombine.low %v638_v33, %v642_v34  ;;  %v654_v51 = vrot.slane %v551_v10, %v1859_v27  ;;  %v658_v52 = vrot.slane %v552_v11, %v1859_v27 }
 0x19c   :  { %v567_v53 = vmul.f32 %v565_v37, %v554_v28  ;;  %v670_v21 = vrot.slane %v551_v10, %v1936_v12  ;;  %v583_v50 = vmul.f32 %v581_v39, %v570_v46  ;;  %v674_v57 = vrot.slane %v552_v11, %v1936_v12  ;;  %v833_v37 = vld [vmem:[#allocation6 + $0x48] sm:$0xff] }
 0x19d   :  { %v661_v3 = vcombine.low %v654_v51, %v658_v52  ;;  %v599_v22 = vmul.f32 %v597_v40, %v586_v56  ;;  %v615_v55 = vmul.f32 %v613_v42, %v602_v6  ;;  %v631_v19 = vmul.f32 %v629_v47, %v618_v41  ;;  %v849_v47 = vld [vmem:[#allocation6 + $0x50] sm:$0xff] }
 0x19e   :  { %v568_v35 = vadd.f32 %v567_v53, %v553_v43  ;;  %v677_v36 = vcombine.low %v670_v21, %v674_v57  ;;  %v647_v44 = vmul.f32 %v645_v48, %v634_v0  ;;  %v881_v57 = vld [vmem:[#allocation6 + $0x60] sm:$0xff] }
 0x19f   :  { %v663_v59 = vmul.f32 %v661_v3, %v650_v26  ;;  %v865_v3 = vld [vmem:[#allocation6 + $0x58] sm:$0xff] }
 0x1a0   :  { %v584_v13 = vadd.f32 %v583_v50, %v568_v35  ;;  %v679_v61 = vmul.f32 %v677_v36, %v666_v54 }
 0x1a2   :  { %v600_v49 = vadd.f32 %v599_v22, %v584_v13  ;;  %v897_v22 = vld [vmem:[#allocation6 + $0x68] sm:$0xff] }
 0x1a4   :  { %v616_v9 = vadd.f32 %v615_v55, %v600_v49  ;;  %v913_v49 = vld [vmem:[#allocation6 + $0x70] sm:$0xff] }
 0x1a6   :  { %v632_v38 = vadd.f32 %v631_v19, %v616_v9  ;;  %v929_v9 = vld [vmem:[#allocation6 + $0x78] sm:$0xff] }
 0x1a8   :  { %v648_v58 = vadd.f32 %v647_v44, %v632_v38 }
 0x1aa   :  { %v664_v60 = vadd.f32 %v663_v59, %v648_v58 }
 0x1ac   :  { %v680_v63 = vadd.f32 %v679_v61, %v664_v60 }
 0x26c   :  { %v811_v1 = vpop.f32.mrb[2].mxu0 }
 0x26d   :  { %v813_v2 = vpop.f32.mrb[3].mxu0  ;;  %v821_v30 = vrot.slane %v811_v1, %v1831_v8  ;;  %v837_v5 = vrot.slane %v811_v1, %v1839_v31  ;;  %v853_v10 = vrot.slane %v811_v1, %v1850_v62  ;;  %v869_v11 = vrot.slane %v811_v1, %v1933_v4 }
 0x26e   :  { %v825_v14 = vrot.slane %v813_v2, %v1831_v8  ;;  %v841_v16 = vrot.slane %v813_v2, %v1839_v31  ;;  %v857_v17 = vrot.slane %v813_v2, %v1850_v62  ;;  %v873_v18 = vrot.slane %v813_v2, %v1933_v4 }
 0x26f   :  { %v885_v23 = vrot.slane %v811_v1, %v1834_v15  ;;  %v889_v24 = vrot.slane %v813_v2, %v1834_v15  ;;  %v901_v25 = vrot.slane %v811_v1, %v1844_v45  ;;  %v905_v28 = vrot.slane %v813_v2, %v1844_v45 }
 0x270   :  { %v828_v29 = vcombine.low %v821_v30, %v825_v14  ;;  %v844_v32 = vcombine.low %v837_v5, %v841_v16  ;;  %v860_v33 = vcombine.low %v853_v10, %v857_v17  ;;  %v876_v34 = vcombine.low %v869_v11, %v873_v18  ;;  %v945_v14 = vld [vmem:[#allocation10] sm:$0x3f]  ;;  %v946_v16 = vld [vmem:[#allocation10 + $0x8] sm:$0x3f] }
 0x271   :  { %v892_v39 = vcombine.low %v885_v23, %v889_v24  ;;  %v908_v40 = vcombine.low %v901_v25, %v905_v28  ;;  %v917_v42 = vrot.slane %v811_v1, %v1859_v27  ;;  %v921_v43 = vrot.slane %v813_v2, %v1859_v27  ;;  %v973_v24 = vld [vmem:[#allocation9 + $0x10] sm:$0x3f]  ;;  %v974_v25 = vld [vmem:[#allocation9 + $0x18] sm:$0x3f] }
 0x272   :  { %v830_v46 = vmul.f32 %v828_v29, %v817_v20  ;;  %v933_v51 = vrot.slane %v811_v1, %v1936_v12  ;;  %v846_v53 = vmul.f32 %v844_v32, %v833_v37  ;;  %v937_v56 = vrot.slane %v813_v2, %v1936_v12  ;;  %v947_v1 = vld [vmem:[#allocation9] sm:$0x3f]  ;;  %v948_v2 = vld [vmem:[#allocation9 + $0x8] sm:$0x3f] }
 0x273   :  { %v924_v48 = vcombine.low %v917_v42, %v921_v43  ;;  %v862_v35 = vmul.f32 %v860_v33, %v849_v47  ;;  %v878_v13 = vmul.f32 %v876_v34, %v865_v3  ;;  %v894_v41 = vmul.f32 %v892_v39, %v881_v57  ;;  %v998_v33 = vld [vmem:[#allocation9 + $0x20] sm:$0x3f]  ;;  %v1024_v47 = vld [vmem:[#allocation9 + $0x38] sm:$0x3f] }
 0x274   :  { %v831_v52 = vadd.f32 %v830_v46, %v680_v63  ;;  %v940_v50 = vcombine.low %v933_v51, %v937_v56  ;;  %v910_v0 = vmul.f32 %v908_v40, %v897_v22  ;;  %v1023_v46 = vld [vmem:[#allocation9 + $0x30] sm:$0x3f] }
 0x275   :  { %v926_v26 = vmul.f32 %v924_v48, %v913_v49  ;;  %v1575_v48 = vmov 1983009808  }
 0x276   :  { %v847_v21 = vadd.f32 %v846_v53, %v831_v52  ;;  %v942_v44 = vmul.f32 %v940_v50, %v929_v9  ;;  %v1063_v51 = vunpack.c.l.s4 %v1575_v48 }
 0x278   :  { %v863_v6 = vadd.f32 %v862_v35, %v847_v21 }
 0x27a   :  { %v879_v36 = vadd.f32 %v878_v13, %v863_v6  ;;  %v1064_v6 = vunpack.c.0.s8 %v1063_v51 }
 0x27c   :  { %v895_v55 = vadd.f32 %v894_v41, %v879_v36  ;;  %v1067_v49 = vsub.s32 %v1064_v6, %v1828_v7 }
 0x27e   :  { %v911_v19 = vadd.f32 %v910_v0, %v895_v55 }
 0x280   :  { %v927_v38 = vadd.f32 %v926_v26, %v911_v19 }
 0x282   :  { %v943_v54 = vadd.f32 %v942_v44, %v927_v38 }
 0x284   :  { %v944_v58 = vmax.f32 %v943_v54, 0.0 }
 0x286   :  { %v953_v59 = vrot.slane %v944_v58, %v1831_v8  ;;  %v957_v60 = vrot.slane %v944_v58, %v1834_v15  ;;  %v978_v61 = vrot.slane %v944_v58, %v1839_v31  ;;  %v982_v63 = vrot.slane %v944_v58, %v1844_v45 }
 0x287   :  { %v1003_v30 = vrot.slane %v944_v58, %v1850_v62  ;;  %v1007_v5 = vrot.slane %v944_v58, %v1859_v27  ;;  %v1028_v10 = vrot.slane %v944_v58, %v1933_v4  ;;  %v1032_v11 = vrot.slane %v944_v58, %v1936_v12  ;;  %v999_v12 = vld [vmem:[#allocation9 + $0x28] sm:$0x3f] }
 0x288   :  { %v963_v17 = vrot.slane %v953_v59, %v1831_v8  ;;  %v967_v18 = vrot.slane %v957_v60, %v1831_v8  ;;  %v988_v20 = vrot.slane %v978_v61, %v1839_v31  ;;  %v992_v23 = vrot.slane %v982_v63, %v1839_v31 }
 0x289   :  { %v1013_v27 = vrot.slane %v1003_v30, %v1850_v62  ;;  %v1017_v32 = vrot.slane %v1007_v5, %v1850_v62  ;;  %v1038_v34 = vrot.slane %v1028_v10, %v1933_v4  ;;  %v1042_v37 = vrot.slane %v1032_v11, %v1933_v4  ;;  %v1213_v11 = vld [vmem:[%s2031_s8 + $0x8] sm:$0xf] }
 0x28a   :  { %v968_v28 = vmul.f32 %v963_v17, %v947_v1  ;;  %v969_v29 = vmul.f32 %v967_v18, %v948_v2  ;;  %v993_v42 = vmul.f32 %v988_v20, %v973_v24  ;;  %v994_v43 = vmul.f32 %v992_v23, %v974_v25  ;;  %v1215_v25 = vld [vmem:[%s2031_s8 + $0x10] sm:$0xf] }
 0x28b   :  { %v1018_v56 = vmul.f32 %v1013_v27, %v998_v33  ;;  %v1019_v3 = vmul.f32 %v1017_v32, %v999_v12  ;;  %v1043_v50 = vmul.f32 %v1038_v34, %v1023_v46  ;;  %v1044_v57 = vmul.f32 %v1042_v37, %v1024_v47  ;;  %v1216_v32 = vld [vmem:[%s2031_s8 + $0x14] sm:$0xf] }
 0x28c   :  { %v970_v39 = vadd.f32 %v968_v28, %v945_v14  ;;  %v971_v40 = vadd.f32 %v969_v29, %v946_v16 }
 0x28e   :  { %v995_v52 = vadd.f32 %v993_v42, %v970_v39  ;;  %v996_v53 = vadd.f32 %v994_v43, %v971_v40 }
 0x290   :  { %v1020_v21 = vadd.f32 %v1018_v56, %v995_v52  ;;  %v1021_v35 = vadd.f32 %v1019_v3, %v996_v53 }
 0x292   :  { %v1045_v13 = vadd.f32 %v1043_v50, %v1020_v21  ;;  %v1046_v22 = vadd.f32 %v1044_v57, %v1021_v35 }
 0x294   :  { %v1047_v36 = vmax.f32 %v1045_v13, 0.0  ;;  %v1048_v41 = vmax.f32 %v1046_v22, 0.0 }
 0x296   :  { %v1054_v55 = vrot.slane %v1047_v36, %v1831_v8  ;;  %v1058_v0 = vrot.slane %v1048_v41, %v1831_v8  ;;  %v1077_v9 = vrot.slane %v1047_v36, %v1839_v31  ;;  %v1081_v19 = vrot.slane %v1048_v41, %v1839_v31  ;;  %v1050_v8 = vld [vmem:[%s2031_s8] sm:$0xf] }
 0x297   :  { %v1100_v26 = vrot.slane %v1047_v36, %v1850_v62  ;;  %v1104_v38 = vrot.slane %v1048_v41, %v1850_v62  ;;  %v1123_v44 = vrot.slane %v1047_v36, %v1933_v4  ;;  %v1127_v54 = vrot.slane %v1048_v41, %v1933_v4  ;;  %v1049_v4 = vld [vmem:[%s2032_s9] sm:$0xf] }
 0x298   :  { %v1061_v58 = vcombine.low %v1054_v55, %v1058_v0  ;;  %v1084_v59 = vcombine.low %v1077_v9, %v1081_v19  ;;  %v1146_v7 = vrot.slane %v1047_v36, %v1834_v15  ;;  %v1150_v60 = vrot.slane %v1048_v41, %v1834_v15  ;;  %v1212_v15 = vld [vmem:[%s2031_s8 + $0x4] sm:$0xf] }
 0x299   :  { %v1107_v61 = vcombine.low %v1100_v26, %v1104_v38  ;;  %v1130_v31 = vcombine.low %v1123_v44, %v1127_v54  ;;  %v1169_v62 = vrot.slane %v1047_v36, %v1844_v45  ;;  %v1173_v2 = vrot.slane %v1048_v41, %v1844_v45  ;;  %v1214_v45 = vld [vmem:[%s2031_s8 + $0xc] sm:$0xf] }
 0x29a   :  { %v1068_v63 = vrot.slane %v1061_v58, %v1067_v49  ;;  %v1091_v1 = vrot.slane %v1084_v59, %v1067_v49  ;;  %v1153_v10 = vcombine.low %v1146_v7, %v1150_v60 }
 0x29b   :  { %v1114_v5 = vrot.slane %v1107_v61, %v1067_v49  ;;  %v1137_v17 = vrot.slane %v1130_v31, %v1067_v49  ;;  %v1176_v18 = vcombine.low %v1169_v62, %v1173_v2 }
 0x29c   :  { %v1070_v30 = vmul.f32 %v1068_v63, %v1050_v8  ;;  %v1093_v16 = vmul.f32 %v1212_v15, %v1091_v1  ;;  %v1160_v24 = vrot.slane %v1153_v10, %v1067_v49 }
 0x29d   :  { %v1116_v23 = vmul.f32 %v1213_v11, %v1114_v5  ;;  %v1139_v29 = vmul.f32 %v1214_v45, %v1137_v17  ;;  %v1183_v27 = vrot.slane %v1176_v18, %v1067_v49 }
 0x29e   :  { %v1071_v14 = vadd.f32 %v1070_v30, %v1049_v4  ;;  %v1162_v12 = vmul.f32 %v1215_v25, %v1160_v24 }
 0x29f   :  { %v1185_v37 = vmul.f32 %v1216_v32, %v1183_v27 }
 0x2a0   :  { %v1094_v20 = vadd.f32 %v1093_v16, %v1071_v14 }
 0x2a2   :  { %v1117_v28 = vadd.f32 %v1116_v23, %v1094_v20 }
 0x2a4   :  { %v1140_v33 = vadd.f32 %v1139_v29, %v1117_v28 }
 0x2a6   :  { %v1163_v34 = vadd.f32 %v1162_v12, %v1140_v33 }
 0x2a8   :  { %v1186_v39 = vadd.f32 %v1185_v37, %v1163_v34 }
 0x2aa   :  { %1187 = vst [vmem:[%s2033_s10] sm:$0xf] %v1186_v39 }
 0x2ab   :  { %1192 = vsyncpa [#allocation3], 1 }
 0x2ac   :  { %1193 = vsyncpa [#allocation5], 1 }
 0x2ad   :  { %1194 = vsyncpa [#allocation8], 1 }
 0x2ae   :  { %1195 = vsyncpa [#allocation11], 1 }

</bundles_post_ra>
